<compile_context>
chip_gen: v7x
topology: tpu7x:2x2x1
jax: 0.10.0
libtpu: 0.0.40
codegen_flags: <defaults>
</compile_context>

<pallas_src>
import functools

import jax
import jax.numpy as jnp
from jax.experimental import pallas as pl
from jax.experimental.pallas import tpu as pltpu


def _layernorm(x, g, b, eps=1e-5):
    mu = jnp.mean(x, axis=-1, keepdims=True)
    var = jnp.mean((x - mu) ** 2, axis=-1, keepdims=True)
    return (x - mu) * jax.lax.rsqrt(var + eps) * g + b


def decoder_block_kernel(
    x_ref,      # (Bb, T, D)      f32
    wqkv_ref,   # (D, 3*H*dh)     bf16   packed [Wq | Wk | Wv]
    wo_ref,     # (H, dh, D)      bf16
    bo_ref,     # (1, D)          f32
    w1_ref,     # (D, 4D)         bf16
    b1_ref,     # (1, 4D)         f32
    w2_ref,     # (4D, D)         bf16
    b2_ref,     # (1, D)          f32
    g1_ref,     # (1, D)          f32
    be1_ref,    # (1, D)          f32
    g2_ref,     # (1, D)          f32
    be2_ref,    # (1, D)          f32
    o_ref,      # (Bb, T, D)
    *,
    n_heads: int,
    d_head: int,
):
    Bb, T, D = x_ref.shape
    H, dh = n_heads, d_head
    HD = H * dh
    scale = float(dh) ** -0.5

    x = x_ref[...].astype(jnp.float32)          # (Bb, T, D)
    x2 = x.reshape(Bb * T, D)                   # token-wise ops: flatten batch
    x_bf = x2.astype(jnp.bfloat16)

    # ---- fused QKV projection: one wide MXU matmul, f32 accumulation -------
    qkv = jnp.dot(x_bf, wqkv_ref[...], preferred_element_type=jnp.float32)  # (Bb*T, 3*HD)

    # causal mask (row >= col), shared by all heads / batch rows in the block
    row = jax.lax.broadcasted_iota(jnp.int32, (T, T), 0)
    col = jax.lax.broadcasted_iota(jnp.int32, (T, T), 1)
    causal = (row >= col)[None]                 # (1, T, T)
    neg_inf = jnp.float32(-1e30)

    # head contexts are contracted directly against wo[h] (dh, D) and summed:
    # no lane-axis concatenate of narrow dh-wide slices.
    attn2 = jnp.broadcast_to(bo_ref[...], (Bb * T, D)).astype(jnp.float32)
    for h in range(H):
        q = qkv[:, h * dh:(h + 1) * dh] * scale                 # scale folded into q
        k = qkv[:, HD + h * dh:HD + (h + 1) * dh]
        v = qkv[:, 2 * HD + h * dh:2 * HD + (h + 1) * dh]
        qb = q.reshape(Bb, T, dh).astype(jnp.bfloat16)
        kb = k.reshape(Bb, T, dh).astype(jnp.bfloat16)
        vb = v.reshape(Bb, T, dh).astype(jnp.bfloat16)

        s = jnp.einsum("bqd,bkd->bqk", qb, kb,
                       preferred_element_type=jnp.float32)      # (Bb, T, T)
        s = jnp.where(causal, s, neg_inf)
        m = jnp.max(s, axis=-1, keepdims=True)
        p = jnp.exp(s - m)
        denom = jnp.sum(p, axis=-1, keepdims=True)
        p = p * pl.reciprocal(denom, approx=True)               # EUP, not VALU divide
        # dropout on p is identity in eval mode

        ctx = jnp.einsum("bqk,bkd->bqd", p.astype(jnp.bfloat16), vb,
                         preferred_element_type=jnp.float32)    # (Bb, T, dh)
        attn2 = attn2 + jnp.dot(ctx.reshape(Bb * T, dh).astype(jnp.bfloat16),
                                wo_ref[h],
                                preferred_element_type=jnp.float32)
    # dropout on attention output is identity in eval mode

    # ---- residual + LayerNorm 1 (f32) ---------------------------------------
    h1 = _layernorm(x2 + attn2, g1_ref[...], be1_ref[...])

    # ---- FeedForward: Linear(D,4D) -> ReLU -> Linear(4D,D) ------------------
    ff = jnp.dot(h1.astype(jnp.bfloat16), w1_ref[...],
                 preferred_element_type=jnp.float32) + b1_ref[...]
    ff = jnp.maximum(ff, 0.0)
    ff = jnp.dot(ff.astype(jnp.bfloat16), w2_ref[...],
                 preferred_element_type=jnp.float32) + b2_ref[...]
    # dropout at the end of the MLP is identity in eval mode

    # ---- residual + LayerNorm 2 ---------------------------------------------
    out = _layernorm(h1 + ff, g2_ref[...], be2_ref[...])
    o_ref[...] = out.reshape(Bb, T, D).astype(o_ref.dtype)


def decoder_block(x, params, *, n_heads, block_b=1, weight_dtype=jnp.bfloat16):
    B, T, D = x.shape
    wq, wk, wv, wo, bo, w1, b1, w2, b2, g1, be1, g2, be2 = params
    dh = D // n_heads
    HD = n_heads * dh
    assert B % block_b == 0, "block_b must divide the batch size"

    # Pack per-head (H, D, dh) projections into one (D, 3*H*dh) matrix so the
    # kernel does a single wide x @ Wqkv instead of 3*H narrow matmuls.
    def pack(w):
        return jnp.transpose(w, (1, 0, 2)).reshape(D, HD)

    wqkv = jnp.concatenate([pack(wq), pack(wk), pack(wv)], axis=-1).astype(weight_dtype)
    wo3 = wo.reshape(n_heads, dh, D).astype(weight_dtype)
    w1c = w1.astype(weight_dtype)
    w2c = w2.astype(weight_dtype)

    # Weight specs: constant block index across the batch grid (resident in VMEM).
    def const_spec(arr):
        nd = arr.ndim
        return pl.BlockSpec(arr.shape, lambda b, _nd=nd: (0,) * _nd)

    kernel = functools.partial(decoder_block_kernel, n_heads=n_heads, d_head=dh)

    return pl.pallas_call(
        kernel,
        out_shape=jax.ShapeDtypeStruct((B, T, D), x.dtype),
        grid_spec=pltpu.PrefetchScalarGridSpec(
            num_scalar_prefetch=0,
            grid=(B // block_b,),
            in_specs=[
                pl.BlockSpec((block_b, T, D), lambda b: (b, 0, 0)),
                const_spec(wqkv),
                const_spec(wo3),
                const_spec(bo),
                const_spec(w1c),
                const_spec(b1),
                const_spec(w2c),
                const_spec(b2),
                const_spec(g1),
                const_spec(be1),
                const_spec(g2),
                const_spec(be2),
            ],
            out_specs=pl.BlockSpec((block_b, T, D), lambda b: (b, 0, 0)),
        ),
        compiler_params=pltpu.CompilerParams(
            # Batch axis is independent -> shard across TensorCores (v7x megacore).
            dimension_semantics=("parallel",),
            vmem_limit_bytes=48 * 1024 * 1024,
        ),
    )(x, wqkv, wo3, bo, w1c, b1, w2c, b2, g1, be1, g2, be2)


def reference_decoder_block(x, params, *, n_heads, matmul_dtype=jnp.float32):
    """Pure-JAX reference (eval-mode semantics).

    matmul_dtype=jnp.float32  -> exact module math.
    matmul_dtype=jnp.bfloat16 -> emulates the kernel's bf16-operand / f32-accum
                                 matmul precision for tight comparison.
    """
    wq, wk, wv, wo, bo, w1, b1, w2, b2, g1, be1, g2, be2 = params
    B, T, D = x.shape
    dh = wq.shape[-1]
    scale = dh ** (-0.5)
    causal = jnp.tril(jnp.ones((T, T), dtype=bool))
    md = matmul_dtype

    def mm(a, b):
        return jnp.matmul(a.astype(md), b.astype(md),
                          preferred_element_type=jnp.float32)

    def ln(v, g, b, eps=1e-5):
        mu = jnp.mean(v, axis=-1, keepdims=True)
        var = jnp.mean((v - mu) ** 2, axis=-1, keepdims=True)
        return (v - mu) / jnp.sqrt(var + eps) * g + b

    heads = []
    for h in range(n_heads):
        q = mm(x, wq[h])
        k = mm(x, wk[h])
        v = mm(x, wv[h])
        s = mm(q * scale, jnp.swapaxes(k, -2, -1))
        s = jnp.where(causal[None], s, -jnp.inf)
        p = jax.nn.softmax(s, axis=-1)
        heads.append(mm(p, v))
    attn = mm(jnp.concatenate(heads, axis=-1), wo) + bo
    h1 = ln(x + attn, g1, be1)
    ff = mm(jnp.maximum(mm(h1, w1) + b1, 0.0), w2) + b2
    return ln(h1 + ff, g2, be2)


if __name__ == "__main__":
    # Small but lane-dense shapes: D and 4D multiples of 128, T multiple of 8.
    B, T, D, H = 2, 16, 128, 4     # batch, block_size, d_embed, n_heads
    dh = D // H                    # d_head

    key = jax.random.PRNGKey(0)
    keys = jax.random.split(key, 10)

    def init(k, shape, scl=0.1):
        return jax.random.normal(k, shape, dtype=jnp.float32) * scl

    x = jax.random.normal(keys[0], (B, T, D), dtype=jnp.float32)

    wq = init(keys[1], (H, D, dh))
    wk = init(keys[2], (H, D, dh))
    wv = init(keys[3], (H, D, dh))
    wo = init(keys[4], (H * dh, D))
    bo = init(keys[5], (1, D))
    w1 = init(keys[6], (D, 4 * D))
    b1 = init(keys[7], (1, 4 * D))
    w2 = init(keys[8], (4 * D, D))
    b2 = init(keys[9], (1, D))
    g1 = jnp.ones((1, D), jnp.float32)
    be1 = jnp.zeros((1, D), jnp.float32)
    g2 = jnp.ones((1, D), jnp.float32)
    be2 = jnp.zeros((1, D), jnp.float32)

    params = (wq, wk, wv, wo, bo, w1, b1, w2, b2, g1, be1, g2, be2)

    out = decoder_block(x, params, n_heads=H, block_b=1)
    out = jax.block_until_ready(out)
    assert out.shape == (B, T, D)

    # Tight check vs a reference with matching (bf16-operand) matmul precision.
    ref_bf = reference_decoder_block(x, params, n_heads=H, matmul_dtype=jnp.bfloat16)
    err_bf = float(jnp.max(jnp.abs(out - ref_bf)))
    assert err_bf < 2e-2, f"mismatch vs bf16-matmul reference: {err_bf}"

    # Loose sanity check vs the exact f32 module math.
    ref_f32 = reference_decoder_block(x, params, n_heads=H, matmul_dtype=jnp.float32)
    err_f32 = float(jnp.max(jnp.abs(out - ref_f32)))
    assert err_f32 < 1e-1, f"mismatch vs f32 reference: {err_f32}"

    # TODO(synk): dropout layers are treated as identity (eval mode); training-mode
    # stochastic dropout would need pltpu.prng_seed / prng_random_bits.
    print("KERNEL_OK")
</pallas_src>

<mosaic_0001>
module attributes {stable_mosaic.version = 11 : i64} {
  func.func @decoder_block_kernel(%arg0: i32, %arg1: memref<1x16x128xf32, #tpu.memory_space<vmem>>, %arg2: memref<128x384xbf16, #tpu.memory_space<vmem>>, %arg3: memref<4x32x128xbf16, #tpu.memory_space<vmem>>, %arg4: memref<1x128xf32, #tpu.memory_space<vmem>>, %arg5: memref<128x512xbf16, #tpu.memory_space<vmem>>, %arg6: memref<1x512xf32, #tpu.memory_space<vmem>>, %arg7: memref<512x128xbf16, #tpu.memory_space<vmem>>, %arg8: memref<1x128xf32, #tpu.memory_space<vmem>>, %arg9: memref<1x128xf32, #tpu.memory_space<vmem>>, %arg10: memref<1x128xf32, #tpu.memory_space<vmem>>, %arg11: memref<1x128xf32, #tpu.memory_space<vmem>>, %arg12: memref<1x128xf32, #tpu.memory_space<vmem>>, %arg13: memref<1x16x128xf32, #tpu.memory_space<vmem>>) attributes {dimension_semantics = [#tpu.dimension_semantics<parallel>], iteration_bounds = array<i64: 2>, scalar_prefetch = 0 : i64, scratch_operands = 0 : i64, tpu.core_type = #tpu.core_type<tc>, window_params = [{transform_indices = @transform_0, window_bounds = array<i64: 1, 16, 128>}, {pipeline_mode = #tpu.pipeline_mode<synchronous>, transform_indices = @transform_1, window_bounds = array<i64: 128, 384>}, {pipeline_mode = #tpu.pipeline_mode<synchronous>, transform_indices = @transform_2, window_bounds = array<i64: 4, 32, 128>}, {pipeline_mode = #tpu.pipeline_mode<synchronous>, transform_indices = @transform_3, window_bounds = array<i64: 1, 128>}, {pipeline_mode = #tpu.pipeline_mode<synchronous>, transform_indices = @transform_4, window_bounds = array<i64: 128, 512>}, {pipeline_mode = #tpu.pipeline_mode<synchronous>, transform_indices = @transform_5, window_bounds = array<i64: 1, 512>}, {pipeline_mode = #tpu.pipeline_mode<synchronous>, transform_indices = @transform_6, window_bounds = array<i64: 512, 128>}, {pipeline_mode = #tpu.pipeline_mode<synchronous>, transform_indices = @transform_7, window_bounds = array<i64: 1, 128>}, {pipeline_mode = #tpu.pipeline_mode<synchronous>, transform_indices = @transform_8, window_bounds = array<i64: 1, 128>}, {pipeline_mode = #tpu.pipeline_mode<synchronous>, transform_indices = @transform_9, window_bounds = array<i64: 1, 128>}, {pipeline_mode = #tpu.pipeline_mode<synchronous>, transform_indices = @transform_10, window_bounds = array<i64: 1, 128>}, {pipeline_mode = #tpu.pipeline_mode<synchronous>, transform_indices = @transform_11, window_bounds = array<i64: 1, 128>}, {transform_indices = @transform_12, window_bounds = array<i64: 1, 16, 128>}]} {
    %c0 = arith.constant 0 : index
    %c0_0 = arith.constant 0 : index
    %c0_1 = arith.constant 0 : index
    %0 = vector.load %arg1[%c0, %c0_0, %c0_1] : memref<1x16x128xf32, #tpu.memory_space<vmem>>, vector<1x16x128xf32>
    %1 = vector.shape_cast %0 : vector<1x16x128xf32> to vector<16x128xf32>
    %2 = arith.truncf %1 : vector<16x128xf32> to vector<16x128xbf16>
    %c0_2 = arith.constant 0 : index
    %c0_3 = arith.constant 0 : index
    %3 = vector.load %arg2[%c0_2, %c0_3] : memref<128x384xbf16, #tpu.memory_space<vmem>>, vector<128x384xbf16>
    %cst = arith.constant dense<0.000000e+00> : vector<16x384xf32>
    %4 = tpu.matmul %2, %3, %cst {dimension_numbers = #tpu.dot_dimension_numbers<[1], [0], [0], [1], [0, 0, 1, 1], [], []>} : vector<16x128xbf16>, vector<128x384xbf16>, vector<16x384xf32> -> vector<16x384xf32>
    %5 = tpu.iota {dimensions = array<i32: 0>} : vector<16x16xi32>
    %6 = tpu.iota {dimensions = array<i32: 1>} : vector<16x16xi32>
    %7 = arith.cmpi sge, %5, %6 : vector<16x16xi32>
    %8 = vector.shape_cast %7 : vector<16x16xi1> to vector<1x16x16xi1>
    %c0_4 = arith.constant 0 : index
    %c0_5 = arith.constant 0 : index
    %9 = vector.load %arg4[%c0_4, %c0_5] : memref<1x128xf32, #tpu.memory_space<vmem>>, vector<1x128xf32>
    %10 = vector.shape_cast %9 : vector<1x128xf32> to vector<1x128xf32>
    %11 = vector.broadcast %10 : vector<1x128xf32> to vector<16x128xf32>
    %12 = vector.extract_strided_slice %4 {offsets = [0, 0], sizes = [16, 32], strides = [1, 1]} : vector<16x384xf32> to vector<16x32xf32>
    %cst_6 = arith.constant 0.176776692 : f32
    %13 = vector.broadcast %cst_6 : f32 to vector<16x32xf32>
    %14 = arith.mulf %12, %13 : vector<16x32xf32>
    %15 = vector.extract_strided_slice %4 {offsets = [0, 128], sizes = [16, 32], strides = [1, 1]} : vector<16x384xf32> to vector<16x32xf32>
    %16 = vector.extract_strided_slice %4 {offsets = [0, 256], sizes = [16, 32], strides = [1, 1]} : vector<16x384xf32> to vector<16x32xf32>
    %17 = vector.shape_cast %14 : vector<16x32xf32> to vector<1x16x32xf32>
    %18 = arith.truncf %17 : vector<1x16x32xf32> to vector<1x16x32xbf16>
    %19 = vector.shape_cast %15 : vector<16x32xf32> to vector<1x16x32xf32>
    %20 = arith.truncf %19 : vector<1x16x32xf32> to vector<1x16x32xbf16>
    %21 = vector.shape_cast %16 : vector<16x32xf32> to vector<1x16x32xf32>
    %22 = arith.truncf %21 : vector<1x16x32xf32> to vector<1x16x32xbf16>
    "tpu.trace_start"() <{level = 10 : i32, message = "bqd,bkd->bqk"}> : () -> ()
    %cst_7 = arith.constant dense<0.000000e+00> : vector<1x16x16xf32>
    %23 = tpu.matmul %18, %20, %cst_7 {dimension_numbers = #tpu.dot_dimension_numbers<[2], [2], [1], [1], [0, 0, 0, 1, 1, 1], [0], [0]>} : vector<1x16x32xbf16>, vector<1x16x32xbf16>, vector<1x16x16xf32> -> vector<1x16x16xf32>
    %cst_8 = arith.constant -1.000000e+30 : f32
    "tpu.trace_stop"() : () -> ()
    %24 = vector.broadcast %cst_8 : f32 to vector<1x16x16xf32>
    %25 = arith.select %8, %23, %24 : vector<1x16x16xi1>, vector<1x16x16xf32>
    %cst_9 = arith.constant dense<0xFF800000> : vector<1x16xf32>
    %26 = vector.multi_reduction <maximumf>, %25, %cst_9 [2] : vector<1x16x16xf32> to vector<1x16xf32>
    %27 = vector.shape_cast %26 : vector<1x16xf32> to vector<1x16x1xf32>
    %28 = vector.broadcast %27 : vector<1x16x1xf32> to vector<1x16x16xf32>
    %29 = arith.subf %25, %28 : vector<1x16x16xf32>
    %30 = math.exp %29 : vector<1x16x16xf32>
    %cst_10 = arith.constant dense<0.000000e+00> : vector<1x16xf32>
    %31 = vector.multi_reduction <add>, %30, %cst_10 [2] : vector<1x16x16xf32> to vector<1x16xf32>
    %32 = vector.shape_cast %31 : vector<1x16xf32> to vector<1x16x1xf32>
    %33 = tpu.reciprocal %32 {approx = true} : vector<1x16x1xf32> -> vector<1x16x1xf32>
    %34 = vector.broadcast %33 : vector<1x16x1xf32> to vector<1x16x16xf32>
    %35 = arith.mulf %30, %34 : vector<1x16x16xf32>
    %36 = arith.truncf %35 : vector<1x16x16xf32> to vector<1x16x16xbf16>
    "tpu.trace_start"() <{level = 10 : i32, message = "bqk,bkd->bqd"}> : () -> ()
    %cst_11 = arith.constant dense<0.000000e+00> : vector<1x16x32xf32>
    %37 = tpu.matmul %36, %22, %cst_11 {dimension_numbers = #tpu.dot_dimension_numbers<[2], [1], [1], [2], [0, 0, 0, 1, 1, 2], [0], [0]>} : vector<1x16x16xbf16>, vector<1x16x32xbf16>, vector<1x16x32xf32> -> vector<1x16x32xf32>
    "tpu.trace_stop"() : () -> ()
    %38 = vector.shape_cast %37 : vector<1x16x32xf32> to vector<16x32xf32>
    %39 = arith.truncf %38 : vector<16x32xf32> to vector<16x32xbf16>
    %c0_12 = arith.constant 0 : index
    %c0_13 = arith.constant 0 : index
    %c0_14 = arith.constant 0 : index
    %40 = vector.load %arg3[%c0_12, %c0_13, %c0_14] : memref<4x32x128xbf16, #tpu.memory_space<vmem>>, vector<1x32x128xbf16>
    %41 = vector.shape_cast %40 : vector<1x32x128xbf16> to vector<32x128xbf16>
    %cst_15 = arith.constant dense<0.000000e+00> : vector<16x128xf32>
    %42 = tpu.matmul %39, %41, %cst_15 {dimension_numbers = #tpu.dot_dimension_numbers<[1], [0], [0], [1], [0, 0, 1, 1], [], []>} : vector<16x32xbf16>, vector<32x128xbf16>, vector<16x128xf32> -> vector<16x128xf32>
    %43 = arith.addf %11, %42 : vector<16x128xf32>
    %44 = vector.extract_strided_slice %4 {offsets = [0, 32], sizes = [16, 32], strides = [1, 1]} : vector<16x384xf32> to vector<16x32xf32>
    %cst_16 = arith.constant 0.176776692 : f32
    %45 = vector.broadcast %cst_16 : f32 to vector<16x32xf32>
    %46 = arith.mulf %44, %45 : vector<16x32xf32>
    %47 = vector.extract_strided_slice %4 {offsets = [0, 160], sizes = [16, 32], strides = [1, 1]} : vector<16x384xf32> to vector<16x32xf32>
    %48 = vector.extract_strided_slice %4 {offsets = [0, 288], sizes = [16, 32], strides = [1, 1]} : vector<16x384xf32> to vector<16x32xf32>
    %49 = vector.shape_cast %46 : vector<16x32xf32> to vector<1x16x32xf32>
    %50 = arith.truncf %49 : vector<1x16x32xf32> to vector<1x16x32xbf16>
    %51 = vector.shape_cast %47 : vector<16x32xf32> to vector<1x16x32xf32>
    %52 = arith.truncf %51 : vector<1x16x32xf32> to vector<1x16x32xbf16>
    %53 = vector.shape_cast %48 : vector<16x32xf32> to vector<1x16x32xf32>
    %54 = arith.truncf %53 : vector<1x16x32xf32> to vector<1x16x32xbf16>
    "tpu.trace_start"() <{level = 10 : i32, message = "bqd,bkd->bqk"}> : () -> ()
    %cst_17 = arith.constant dense<0.000000e+00> : vector<1x16x16xf32>
    %55 = tpu.matmul %50, %52, %cst_17 {dimension_numbers = #tpu.dot_dimension_numbers<[2], [2], [1], [1], [0, 0, 0, 1, 1, 1], [0], [0]>} : vector<1x16x32xbf16>, vector<1x16x32xbf16>, vector<1x16x16xf32> -> vector<1x16x16xf32>
    %cst_18 = arith.constant -1.000000e+30 : f32
    "tpu.trace_stop"() : () -> ()
    %56 = vector.broadcast %cst_18 : f32 to vector<1x16x16xf32>
    %57 = arith.select %8, %55, %56 : vector<1x16x16xi1>, vector<1x16x16xf32>
    %cst_19 = arith.constant dense<0xFF800000> : vector<1x16xf32>
    %58 = vector.multi_reduction <maximumf>, %57, %cst_19 [2] : vector<1x16x16xf32> to vector<1x16xf32>
    %59 = vector.shape_cast %58 : vector<1x16xf32> to vector<1x16x1xf32>
    %60 = vector.broadcast %59 : vector<1x16x1xf32> to vector<1x16x16xf32>
    %61 = arith.subf %57, %60 : vector<1x16x16xf32>
    %62 = math.exp %61 : vector<1x16x16xf32>
    %cst_20 = arith.constant dense<0.000000e+00> : vector<1x16xf32>
    %63 = vector.multi_reduction <add>, %62, %cst_20 [2] : vector<1x16x16xf32> to vector<1x16xf32>
    %64 = vector.shape_cast %63 : vector<1x16xf32> to vector<1x16x1xf32>
    %65 = tpu.reciprocal %64 {approx = true} : vector<1x16x1xf32> -> vector<1x16x1xf32>
    %66 = vector.broadcast %65 : vector<1x16x1xf32> to vector<1x16x16xf32>
    %67 = arith.mulf %62, %66 : vector<1x16x16xf32>
    %68 = arith.truncf %67 : vector<1x16x16xf32> to vector<1x16x16xbf16>
    "tpu.trace_start"() <{level = 10 : i32, message = "bqk,bkd->bqd"}> : () -> ()
    %cst_21 = arith.constant dense<0.000000e+00> : vector<1x16x32xf32>
    %69 = tpu.matmul %68, %54, %cst_21 {dimension_numbers = #tpu.dot_dimension_numbers<[2], [1], [1], [2], [0, 0, 0, 1, 1, 2], [0], [0]>} : vector<1x16x16xbf16>, vector<1x16x32xbf16>, vector<1x16x32xf32> -> vector<1x16x32xf32>
    "tpu.trace_stop"() : () -> ()
    %70 = vector.shape_cast %69 : vector<1x16x32xf32> to vector<16x32xf32>
    %71 = arith.truncf %70 : vector<16x32xf32> to vector<16x32xbf16>
    %c1 = arith.constant 1 : index
    %c0_22 = arith.constant 0 : index
    %c0_23 = arith.constant 0 : index
    %72 = vector.load %arg3[%c1, %c0_22, %c0_23] : memref<4x32x128xbf16, #tpu.memory_space<vmem>>, vector<1x32x128xbf16>
    %73 = vector.shape_cast %72 : vector<1x32x128xbf16> to vector<32x128xbf16>
    %cst_24 = arith.constant dense<0.000000e+00> : vector<16x128xf32>
    %74 = tpu.matmul %71, %73, %cst_24 {dimension_numbers = #tpu.dot_dimension_numbers<[1], [0], [0], [1], [0, 0, 1, 1], [], []>} : vector<16x32xbf16>, vector<32x128xbf16>, vector<16x128xf32> -> vector<16x128xf32>
    %75 = arith.addf %43, %74 : vector<16x128xf32>
    %76 = vector.extract_strided_slice %4 {offsets = [0, 64], sizes = [16, 32], strides = [1, 1]} : vector<16x384xf32> to vector<16x32xf32>
    %cst_25 = arith.constant 0.176776692 : f32
    %77 = vector.broadcast %cst_25 : f32 to vector<16x32xf32>
    %78 = arith.mulf %76, %77 : vector<16x32xf32>
    %79 = vector.extract_strided_slice %4 {offsets = [0, 192], sizes = [16, 32], strides = [1, 1]} : vector<16x384xf32> to vector<16x32xf32>
    %80 = vector.extract_strided_slice %4 {offsets = [0, 320], sizes = [16, 32], strides = [1, 1]} : vector<16x384xf32> to vector<16x32xf32>
    %81 = vector.shape_cast %78 : vector<16x32xf32> to vector<1x16x32xf32>
    %82 = arith.truncf %81 : vector<1x16x32xf32> to vector<1x16x32xbf16>
    %83 = vector.shape_cast %79 : vector<16x32xf32> to vector<1x16x32xf32>
    %84 = arith.truncf %83 : vector<1x16x32xf32> to vector<1x16x32xbf16>
    %85 = vector.shape_cast %80 : vector<16x32xf32> to vector<1x16x32xf32>
    %86 = arith.truncf %85 : vector<1x16x32xf32> to vector<1x16x32xbf16>
    "tpu.trace_start"() <{level = 10 : i32, message = "bqd,bkd->bqk"}> : () -> ()
    %cst_26 = arith.constant dense<0.000000e+00> : vector<1x16x16xf32>
    %87 = tpu.matmul %82, %84, %cst_26 {dimension_numbers = #tpu.dot_dimension_numbers<[2], [2], [1], [1], [0, 0, 0, 1, 1, 1], [0], [0]>} : vector<1x16x32xbf16>, vector<1x16x32xbf16>, vector<1x16x16xf32> -> vector<1x16x16xf32>
    %cst_27 = arith.constant -1.000000e+30 : f32
    "tpu.trace_stop"() : () -> ()
    %88 = vector.broadcast %cst_27 : f32 to vector<1x16x16xf32>
    %89 = arith.select %8, %87, %88 : vector<1x16x16xi1>, vector<1x16x16xf32>
    %cst_28 = arith.constant dense<0xFF800000> : vector<1x16xf32>
    %90 = vector.multi_reduction <maximumf>, %89, %cst_28 [2] : vector<1x16x16xf32> to vector<1x16xf32>
    %91 = vector.shape_cast %90 : vector<1x16xf32> to vector<1x16x1xf32>
    %92 = vector.broadcast %91 : vector<1x16x1xf32> to vector<1x16x16xf32>
    %93 = arith.subf %89, %92 : vector<1x16x16xf32>
    %94 = math.exp %93 : vector<1x16x16xf32>
    %cst_29 = arith.constant dense<0.000000e+00> : vector<1x16xf32>
    %95 = vector.multi_reduction <add>, %94, %cst_29 [2] : vector<1x16x16xf32> to vector<1x16xf32>
    %96 = vector.shape_cast %95 : vector<1x16xf32> to vector<1x16x1xf32>
    %97 = tpu.reciprocal %96 {approx = true} : vector<1x16x1xf32> -> vector<1x16x1xf32>
    %98 = vector.broadcast %97 : vector<1x16x1xf32> to vector<1x16x16xf32>
    %99 = arith.mulf %94, %98 : vector<1x16x16xf32>
    %100 = arith.truncf %99 : vector<1x16x16xf32> to vector<1x16x16xbf16>
    "tpu.trace_start"() <{level = 10 : i32, message = "bqk,bkd->bqd"}> : () -> ()
    %cst_30 = arith.constant dense<0.000000e+00> : vector<1x16x32xf32>
    %101 = tpu.matmul %100, %86, %cst_30 {dimension_numbers = #tpu.dot_dimension_numbers<[2], [1], [1], [2], [0, 0, 0, 1, 1, 2], [0], [0]>} : vector<1x16x16xbf16>, vector<1x16x32xbf16>, vector<1x16x32xf32> -> vector<1x16x32xf32>
    "tpu.trace_stop"() : () -> ()
    %102 = vector.shape_cast %101 : vector<1x16x32xf32> to vector<16x32xf32>
    %103 = arith.truncf %102 : vector<16x32xf32> to vector<16x32xbf16>
    %c2 = arith.constant 2 : index
    %c0_31 = arith.constant 0 : index
    %c0_32 = arith.constant 0 : index
    %104 = vector.load %arg3[%c2, %c0_31, %c0_32] : memref<4x32x128xbf16, #tpu.memory_space<vmem>>, vector<1x32x128xbf16>
    %105 = vector.shape_cast %104 : vector<1x32x128xbf16> to vector<32x128xbf16>
    %cst_33 = arith.constant dense<0.000000e+00> : vector<16x128xf32>
    %106 = tpu.matmul %103, %105, %cst_33 {dimension_numbers = #tpu.dot_dimension_numbers<[1], [0], [0], [1], [0, 0, 1, 1], [], []>} : vector<16x32xbf16>, vector<32x128xbf16>, vector<16x128xf32> -> vector<16x128xf32>
    %107 = arith.addf %75, %106 : vector<16x128xf32>
    %108 = vector.extract_strided_slice %4 {offsets = [0, 96], sizes = [16, 32], strides = [1, 1]} : vector<16x384xf32> to vector<16x32xf32>
    %cst_34 = arith.constant 0.176776692 : f32
    %109 = vector.broadcast %cst_34 : f32 to vector<16x32xf32>
    %110 = arith.mulf %108, %109 : vector<16x32xf32>
    %111 = vector.extract_strided_slice %4 {offsets = [0, 224], sizes = [16, 32], strides = [1, 1]} : vector<16x384xf32> to vector<16x32xf32>
    %112 = vector.extract_strided_slice %4 {offsets = [0, 352], sizes = [16, 32], strides = [1, 1]} : vector<16x384xf32> to vector<16x32xf32>
    %113 = vector.shape_cast %110 : vector<16x32xf32> to vector<1x16x32xf32>
    %114 = arith.truncf %113 : vector<1x16x32xf32> to vector<1x16x32xbf16>
    %115 = vector.shape_cast %111 : vector<16x32xf32> to vector<1x16x32xf32>
    %116 = arith.truncf %115 : vector<1x16x32xf32> to vector<1x16x32xbf16>
    %117 = vector.shape_cast %112 : vector<16x32xf32> to vector<1x16x32xf32>
    %118 = arith.truncf %117 : vector<1x16x32xf32> to vector<1x16x32xbf16>
    "tpu.trace_start"() <{level = 10 : i32, message = "bqd,bkd->bqk"}> : () -> ()
    %cst_35 = arith.constant dense<0.000000e+00> : vector<1x16x16xf32>
    %119 = tpu.matmul %114, %116, %cst_35 {dimension_numbers = #tpu.dot_dimension_numbers<[2], [2], [1], [1], [0, 0, 0, 1, 1, 1], [0], [0]>} : vector<1x16x32xbf16>, vector<1x16x32xbf16>, vector<1x16x16xf32> -> vector<1x16x16xf32>
    %cst_36 = arith.constant -1.000000e+30 : f32
    "tpu.trace_stop"() : () -> ()
    %120 = vector.broadcast %cst_36 : f32 to vector<1x16x16xf32>
    %121 = arith.select %8, %119, %120 : vector<1x16x16xi1>, vector<1x16x16xf32>
    %cst_37 = arith.constant dense<0xFF800000> : vector<1x16xf32>
    %122 = vector.multi_reduction <maximumf>, %121, %cst_37 [2] : vector<1x16x16xf32> to vector<1x16xf32>
    %123 = vector.shape_cast %122 : vector<1x16xf32> to vector<1x16x1xf32>
    %124 = vector.broadcast %123 : vector<1x16x1xf32> to vector<1x16x16xf32>
    %125 = arith.subf %121, %124 : vector<1x16x16xf32>
    %126 = math.exp %125 : vector<1x16x16xf32>
    %cst_38 = arith.constant dense<0.000000e+00> : vector<1x16xf32>
    %127 = vector.multi_reduction <add>, %126, %cst_38 [2] : vector<1x16x16xf32> to vector<1x16xf32>
    %128 = vector.shape_cast %127 : vector<1x16xf32> to vector<1x16x1xf32>
    %129 = tpu.reciprocal %128 {approx = true} : vector<1x16x1xf32> -> vector<1x16x1xf32>
    %130 = vector.broadcast %129 : vector<1x16x1xf32> to vector<1x16x16xf32>
    %131 = arith.mulf %126, %130 : vector<1x16x16xf32>
    %132 = arith.truncf %131 : vector<1x16x16xf32> to vector<1x16x16xbf16>
    "tpu.trace_start"() <{level = 10 : i32, message = "bqk,bkd->bqd"}> : () -> ()
    %cst_39 = arith.constant dense<0.000000e+00> : vector<1x16x32xf32>
    %133 = tpu.matmul %132, %118, %cst_39 {dimension_numbers = #tpu.dot_dimension_numbers<[2], [1], [1], [2], [0, 0, 0, 1, 1, 2], [0], [0]>} : vector<1x16x16xbf16>, vector<1x16x32xbf16>, vector<1x16x32xf32> -> vector<1x16x32xf32>
    "tpu.trace_stop"() : () -> ()
    %134 = vector.shape_cast %133 : vector<1x16x32xf32> to vector<16x32xf32>
    %135 = arith.truncf %134 : vector<16x32xf32> to vector<16x32xbf16>
    %c3 = arith.constant 3 : index
    %c0_40 = arith.constant 0 : index
    %c0_41 = arith.constant 0 : index
    %136 = vector.load %arg3[%c3, %c0_40, %c0_41] : memref<4x32x128xbf16, #tpu.memory_space<vmem>>, vector<1x32x128xbf16>
    %137 = vector.shape_cast %136 : vector<1x32x128xbf16> to vector<32x128xbf16>
    %cst_42 = arith.constant dense<0.000000e+00> : vector<16x128xf32>
    %138 = tpu.matmul %135, %137, %cst_42 {dimension_numbers = #tpu.dot_dimension_numbers<[1], [0], [0], [1], [0, 0, 1, 1], [], []>} : vector<16x32xbf16>, vector<32x128xbf16>, vector<16x128xf32> -> vector<16x128xf32>
    %139 = arith.addf %107, %138 : vector<16x128xf32>
    %140 = arith.addf %1, %139 : vector<16x128xf32>
    %c0_43 = arith.constant 0 : index
    %c0_44 = arith.constant 0 : index
    %141 = vector.load %arg9[%c0_43, %c0_44] : memref<1x128xf32, #tpu.memory_space<vmem>>, vector<1x128xf32>
    %c0_45 = arith.constant 0 : index
    %c0_46 = arith.constant 0 : index
    %142 = vector.load %arg10[%c0_45, %c0_46] : memref<1x128xf32, #tpu.memory_space<vmem>>, vector<1x128xf32>
    %cst_47 = arith.constant dense<0.000000e+00> : vector<16xf32>
    %143 = vector.multi_reduction <add>, %140, %cst_47 [1] : vector<16x128xf32> to vector<16xf32>
    %144 = vector.shape_cast %143 : vector<16xf32> to vector<16x1xf32>
    %cst_48 = arith.constant 1.280000e+02 : f32
    %145 = vector.broadcast %cst_48 : f32 to vector<16x1xf32>
    %146 = arith.divf %144, %145 : vector<16x1xf32>
    %147 = vector.broadcast %146 : vector<16x1xf32> to vector<16x128xf32>
    %148 = arith.subf %140, %147 : vector<16x128xf32>
    %149 = arith.mulf %148, %148 : vector<16x128xf32>
    %cst_49 = arith.constant dense<0.000000e+00> : vector<16xf32>
    %150 = vector.multi_reduction <add>, %149, %cst_49 [1] : vector<16x128xf32> to vector<16xf32>
    %151 = vector.shape_cast %150 : vector<16xf32> to vector<16x1xf32>
    %cst_50 = arith.constant 1.280000e+02 : f32
    %152 = vector.broadcast %cst_50 : f32 to vector<16x1xf32>
    %153 = arith.divf %151, %152 : vector<16x1xf32>
    %154 = vector.broadcast %146 : vector<16x1xf32> to vector<16x128xf32>
    %155 = arith.subf %140, %154 : vector<16x128xf32>
    %cst_51 = arith.constant 9.99999974E-6 : f32
    %156 = vector.broadcast %cst_51 : f32 to vector<16x1xf32>
    %157 = arith.addf %153, %156 : vector<16x1xf32>
    %158 = math.rsqrt %157 : vector<16x1xf32>
    %159 = vector.broadcast %158 : vector<16x1xf32> to vector<16x128xf32>
    %160 = arith.mulf %155, %159 : vector<16x128xf32>
    %161 = vector.broadcast %141 : vector<1x128xf32> to vector<16x128xf32>
    %162 = arith.mulf %160, %161 : vector<16x128xf32>
    %163 = vector.broadcast %142 : vector<1x128xf32> to vector<16x128xf32>
    %164 = arith.addf %162, %163 : vector<16x128xf32>
    %165 = arith.truncf %164 : vector<16x128xf32> to vector<16x128xbf16>
    %c0_52 = arith.constant 0 : index
    %c0_53 = arith.constant 0 : index
    %166 = vector.load %arg5[%c0_52, %c0_53] : memref<128x512xbf16, #tpu.memory_space<vmem>>, vector<128x512xbf16>
    %cst_54 = arith.constant dense<0.000000e+00> : vector<16x512xf32>
    %167 = tpu.matmul %165, %166, %cst_54 {dimension_numbers = #tpu.dot_dimension_numbers<[1], [0], [0], [1], [0, 0, 1, 1], [], []>} : vector<16x128xbf16>, vector<128x512xbf16>, vector<16x512xf32> -> vector<16x512xf32>
    %c0_55 = arith.constant 0 : index
    %c0_56 = arith.constant 0 : index
    %168 = vector.load %arg6[%c0_55, %c0_56] : memref<1x512xf32, #tpu.memory_space<vmem>>, vector<1x512xf32>
    %169 = vector.broadcast %168 : vector<1x512xf32> to vector<16x512xf32>
    %170 = arith.addf %167, %169 : vector<16x512xf32>
    %cst_57 = arith.constant 0.000000e+00 : f32
    %171 = vector.broadcast %cst_57 : f32 to vector<16x512xf32>
    %172 = arith.maximumf %170, %171 : vector<16x512xf32>
    %173 = arith.truncf %172 : vector<16x512xf32> to vector<16x512xbf16>
    %c0_58 = arith.constant 0 : index
    %c0_59 = arith.constant 0 : index
    %174 = vector.load %arg7[%c0_58, %c0_59] : memref<512x128xbf16, #tpu.memory_space<vmem>>, vector<512x128xbf16>
    %cst_60 = arith.constant dense<0.000000e+00> : vector<16x128xf32>
    %175 = tpu.matmul %173, %174, %cst_60 {dimension_numbers = #tpu.dot_dimension_numbers<[1], [0], [0], [1], [0, 0, 1, 1], [], []>} : vector<16x512xbf16>, vector<512x128xbf16>, vector<16x128xf32> -> vector<16x128xf32>
    %c0_61 = arith.constant 0 : index
    %c0_62 = arith.constant 0 : index
    %176 = vector.load %arg8[%c0_61, %c0_62] : memref<1x128xf32, #tpu.memory_space<vmem>>, vector<1x128xf32>
    %177 = vector.broadcast %176 : vector<1x128xf32> to vector<16x128xf32>
    %178 = arith.addf %175, %177 : vector<16x128xf32>
    %179 = arith.addf %164, %178 : vector<16x128xf32>
    %c0_63 = arith.constant 0 : index
    %c0_64 = arith.constant 0 : index
    %180 = vector.load %arg11[%c0_63, %c0_64] : memref<1x128xf32, #tpu.memory_space<vmem>>, vector<1x128xf32>
    %c0_65 = arith.constant 0 : index
    %c0_66 = arith.constant 0 : index
    %181 = vector.load %arg12[%c0_65, %c0_66] : memref<1x128xf32, #tpu.memory_space<vmem>>, vector<1x128xf32>
    %cst_67 = arith.constant dense<0.000000e+00> : vector<16xf32>
    %182 = vector.multi_reduction <add>, %179, %cst_67 [1] : vector<16x128xf32> to vector<16xf32>
    %183 = vector.shape_cast %182 : vector<16xf32> to vector<16x1xf32>
    %cst_68 = arith.constant 1.280000e+02 : f32
    %184 = vector.broadcast %cst_68 : f32 to vector<16x1xf32>
    %185 = arith.divf %183, %184 : vector<16x1xf32>
    %186 = vector.broadcast %185 : vector<16x1xf32> to vector<16x128xf32>
    %187 = arith.subf %179, %186 : vector<16x128xf32>
    %188 = arith.mulf %187, %187 : vector<16x128xf32>
    %cst_69 = arith.constant dense<0.000000e+00> : vector<16xf32>
    %189 = vector.multi_reduction <add>, %188, %cst_69 [1] : vector<16x128xf32> to vector<16xf32>
    %190 = vector.shape_cast %189 : vector<16xf32> to vector<16x1xf32>
    %cst_70 = arith.constant 1.280000e+02 : f32
    %191 = vector.broadcast %cst_70 : f32 to vector<16x1xf32>
    %192 = arith.divf %190, %191 : vector<16x1xf32>
    %193 = vector.broadcast %185 : vector<16x1xf32> to vector<16x128xf32>
    %194 = arith.subf %179, %193 : vector<16x128xf32>
    %cst_71 = arith.constant 9.99999974E-6 : f32
    %195 = vector.broadcast %cst_71 : f32 to vector<16x1xf32>
    %196 = arith.addf %192, %195 : vector<16x1xf32>
    %197 = math.rsqrt %196 : vector<16x1xf32>
    %198 = vector.broadcast %197 : vector<16x1xf32> to vector<16x128xf32>
    %199 = arith.mulf %194, %198 : vector<16x128xf32>
    %200 = vector.broadcast %180 : vector<1x128xf32> to vector<16x128xf32>
    %201 = arith.mulf %199, %200 : vector<16x128xf32>
    %202 = vector.broadcast %181 : vector<1x128xf32> to vector<16x128xf32>
    %203 = arith.addf %201, %202 : vector<16x128xf32>
    %204 = vector.shape_cast %203 : vector<16x128xf32> to vector<1x16x128xf32>
    %c0_72 = arith.constant 0 : index
    %c0_73 = arith.constant 0 : index
    %c0_74 = arith.constant 0 : index
    %205 = vector.load %arg13[%c0_72, %c0_73, %c0_74] : memref<1x16x128xf32, #tpu.memory_space<vmem>>, vector<1x16x128xf32>
    tpu.vector_store %arg13[%c0_72, %c0_73, %c0_74], %204 {strides = array<i32>} : memref<1x16x128xf32, #tpu.memory_space<vmem>>, vector<1x16x128xf32>,
    return
  }
  func.func @transform_0(%arg0: i32) -> (i32, i32, i32) {
    %c0_i32 = arith.constant 0 : i32
    %c0_i32_0 = arith.constant 0 : i32
    %c0_i32_1 = arith.constant 0 : i32
    return %arg0, %c0_i32, %c0_i32_0 : i32, i32, i32
  }
  func.func @transform_1(%arg0: i32) -> (i32, i32) {
    %c0_i32 = arith.constant 0 : i32
    %c0_i32_0 = arith.constant 0 : i32
    %c0_i32_1 = arith.constant 0 : i32
    return %c0_i32, %c0_i32_0 : i32, i32
  }
  func.func @transform_2(%arg0: i32) -> (i32, i32, i32) {
    %c0_i32 = arith.constant 0 : i32
    %c0_i32_0 = arith.constant 0 : i32
    %c0_i32_1 = arith.constant 0 : i32
    %c0_i32_2 = arith.constant 0 : i32
    return %c0_i32, %c0_i32_0, %c0_i32_1 : i32, i32, i32
  }
  func.func @transform_3(%arg0: i32) -> (i32, i32) {
    %c0_i32 = arith.constant 0 : i32
    %c0_i32_0 = arith.constant 0 : i32
    %c0_i32_1 = arith.constant 0 : i32
    return %c0_i32, %c0_i32_0 : i32, i32
  }
  func.func @transform_4(%arg0: i32) -> (i32, i32) {
    %c0_i32 = arith.constant 0 : i32
    %c0_i32_0 = arith.constant 0 : i32
    %c0_i32_1 = arith.constant 0 : i32
    return %c0_i32, %c0_i32_0 : i32, i32
  }
  func.func @transform_5(%arg0: i32) -> (i32, i32) {
    %c0_i32 = arith.constant 0 : i32
    %c0_i32_0 = arith.constant 0 : i32
    %c0_i32_1 = arith.constant 0 : i32
    return %c0_i32, %c0_i32_0 : i32, i32
  }
  func.func @transform_6(%arg0: i32) -> (i32, i32) {
    %c0_i32 = arith.constant 0 : i32
    %c0_i32_0 = arith.constant 0 : i32
    %c0_i32_1 = arith.constant 0 : i32
    return %c0_i32, %c0_i32_0 : i32, i32
  }
  func.func @transform_7(%arg0: i32) -> (i32, i32) {
    %c0_i32 = arith.constant 0 : i32
    %c0_i32_0 = arith.constant 0 : i32
    %c0_i32_1 = arith.constant 0 : i32
    return %c0_i32, %c0_i32_0 : i32, i32
  }
  func.func @transform_8(%arg0: i32) -> (i32, i32) {
    %c0_i32 = arith.constant 0 : i32
    %c0_i32_0 = arith.constant 0 : i32
    %c0_i32_1 = arith.constant 0 : i32
    return %c0_i32, %c0_i32_0 : i32, i32
  }
  func.func @transform_9(%arg0: i32) -> (i32, i32) {
    %c0_i32 = arith.constant 0 : i32
    %c0_i32_0 = arith.constant 0 : i32
    %c0_i32_1 = arith.constant 0 : i32
    return %c0_i32, %c0_i32_0 : i32, i32
  }
  func.func @transform_10(%arg0: i32) -> (i32, i32) {
    %c0_i32 = arith.constant 0 : i32
    %c0_i32_0 = arith.constant 0 : i32
    %c0_i32_1 = arith.constant 0 : i32
    return %c0_i32, %c0_i32_0 : i32, i32
  }
  func.func @transform_11(%arg0: i32) -> (i32, i32) {
    %c0_i32 = arith.constant 0 : i32
    %c0_i32_0 = arith.constant 0 : i32
    %c0_i32_1 = arith.constant 0 : i32
    return %c0_i32, %c0_i32_0 : i32, i32
  }
  func.func @transform_12(%arg0: i32) -> (i32, i32, i32) {
    %c0_i32 = arith.constant 0 : i32
    %c0_i32_0 = arith.constant 0 : i32
    %c0_i32_1 = arith.constant 0 : i32
    return %arg0, %c0_i32, %c0_i32_0 : i32, i32, i32
  }
}

</mosaic_0001>

<bundles_post_ra>
// kernel: tpu_custom_call.1
= control target key start
LH: loop header
LB: loop body
LE: loop exit
PB: predicated region body
PF: predicated region fallthrough
CT: control target
= control target key end

     0   :  { %s3745_s0 = inlined_call_operand.hbm [shape: f32[2,16,128], index: 0, kind: input, shape index: {}]   ;;  %s3746_s1 = inlined_call_operand.hbm [shape: bf16[128,384], index: 1, kind: input, shape index: {}]   ;;  %s3747_s2 = inlined_call_operand.hbm [shape: bf16[4,32,128], index: 2, kind: input, shape index: {}]   ;;  %s3748_s3 = inlined_call_operand.vmem [shape: f32[1,128], index: 3, kind: input, shape index: {}]   ;;  %s3749_s4 = inlined_call_operand.hbm [shape: bf16[128,512], index: 4, kind: input, shape index: {}]   ;;  %s3750_s5 = inlined_call_operand.vmem [shape: f32[1,512], index: 5, kind: input, shape index: {}]   ;;  %s3751_s6 = inlined_call_operand.hbm [shape: bf16[512,128], index: 6, kind: input, shape index: {}]   ;;  %s3752_s7 = inlined_call_operand.vmem [shape: f32[1,128], index: 7, kind: input, shape index: {}]   ;;  %s3753_s8 = inlined_call_operand.vmem [shape: f32[1,128], index: 8, kind: input, shape index: {}]   ;;  %s3754_s9 = inlined_call_operand.vmem [shape: f32[1,128], index: 9, kind: input, shape index: {}]   ;;  %s3755_s10 = inlined_call_operand.vmem [shape: f32[1,128], index: 10, kind: input, shape index: {}]   ;;  %s3756_s11 = inlined_call_operand.vmem [shape: f32[1,128], index: 11, kind: input, shape index: {}]   ;;  %s3757_s12 = inlined_call_operand.hbm [shape: f32[2,16,128], index: 12, kind: output, shape index: {}]  }
   0x1   :  { %3764 = sst [smem:[#allocation18_spill]] %s3746_s1 }
   0x2   :  { %3765 = sst [smem:[#allocation19_spill]] %s3755_s10 }
   0x3   :  { %3766 = sst [smem:[#allocation20_spill]] %s3756_s11 }
   0x4   :  { %3767 = sst [smem:[#allocation21_spill]] %s3757_s12 }
   0x5   :  { %17 = vsyncpa [#allocation3], 0 }
   0x6   :  { %19 = vsyncpa [#allocation3 + $0x1], 0 }
   0x7   :  { %20 = vsyncpa [#allocation6], 0 }
   0x8   :  { %21 = vsyncpa [#allocation9], 0 }
   0x9   :  { %22 = vsyncpa [#allocation4], 0 }
   0xa   :  { %24 = vsyncpa [#allocation4 + $0x1], 0  ;;  %s3259_s21 = smov 0   ;;  %s3261_s22 = smov 0  }
   0xb   :  { %s3263_s23 = smov 0   ;;  %s3265_s24 = smov 0  }
   0xc LB: > { %3768 = sst [smem:[#allocation16_spill]] %s3158_s21  ;;  %s3280_s25 = sadd.s32 4294967295, %s3170_s24   ;;  %s3170_s24 = sphi %s3265_s24, %s3795_s24   ;;  %s3166_s23 = sphi %s3263_s23, %s3794_s23   ;;  %s3162_s22 = sphi %s3261_s22, %s3793_s22   ;;  %s3158_s21 = sphi %s3259_s21, %s3792_s21  }
   0xd   : > { %s2372_s26 = sadd.s32 4294967294, %s3170_s24   ;;  %p50_p0 = scmp.ne.s32.totalorder %s3162_s22, %s3158_s21 }
   0xe   : > { %p3759_p1 = scmp.eq.s32.totalorder %s3280_s25, 0  ;;  %p311_p3 = scmp.eq.s32.totalorder %s2372_s26, 1 }
   0xf   : > { %p2373_p5 = scmp.ge.s32.totalorder %s3170_s24, 1  ;;  %p318_p7 = scmp.lt.s32.totalorder %s3170_s24, 3 }
  0x10   : > { %p3289_p4 = por %p3759_p1, %p50_p0  ;;  %p3294_p6 = por %p311_p3, %p50_p0 }
  0x11   : > { %p3299_p8 = pnand %p2373_p5, %p318_p7  ;;  %s3172_s30 = smov [#allocation5]  }
  0x12   : > { %s3769_s27 = scalar_select %p3289_p4, 1, 0 }
  0x13   : > { %s3770_s28 = scalar_select %p3294_p6, 1, 0 }
  0x14   : > { %s3772_s29 = scalar_select %p3299_p8, 1, 0 }
  0x15   : > { %3771 = sst [smem:[#allocation17_spill]] %s3770_s28  ;;  %s330_s13 = sshll.u32 %s3172_s30, 4  ;;  %s3303_s13 = int_to_ptr.vmem [resolvable:$true] %s330_s13 }
  0x16   : > { %p2711_p9 = pneg %p3299_p8  ;;  %s3173_s15 = smov [#allocation8]  }
  0x17   : > { %s359_s16 = sshll.u32 %s3173_s15, 4  ;;  %s3774_s1 = sld [smem:[#allocation18_spill]]  ;;  %s3314_s16 = int_to_ptr.vmem [resolvable:$true] %s359_s16 }
  0x18   : > { %p3310_p11 = pnand %p2711_p9, %p3759_p1 }
  0x1a   : > { %p3324_p13 = pneg %p3310_p11 }
  0x1d   : > { %s2954_s19 = scalar_lea.hbm %s3774_s1, 3072 }
  0x1e   : > { %p2955_p12 = scmp.ne.s32.totalorder %s3774_s1, %s2954_s19  ;;  %p2961_p5 = scmp.lt.u32.totalorder %s2954_s19, %s3774_s1 }
  0x20   : > { %p2957_p0 = pnand %p3324_p13, %p2955_p12 }
  0x22   : > { %p2958_p3 = pneg %p2957_p0 }
  0x24   : > { %p2963_p7 = pnand %p2961_p5, %p2958_p3 }
  0x26   : > { %2966 = shalt.err (!%p2963_p7)
}
  0x27   : > { %s2967_s17 = scalar_lea.vmem %s3303_s13, 3072  ;;  %p2975_p2 = scmp.lt.s32.totalorder %s3303_s13, %s3303_s13 }
  0x28   : > { %p2968_p9 = scmp.ne.s32.totalorder %s3303_s13, %s2967_s17  ;;  %p2976_p6 = scmp.lt.s32.totalorder %s2967_s17, %s2967_s17 }
  0x2a   : > { %p2970_p10 = pnand %p2968_p9, %p3324_p13  ;;  %p2977_p12 = por %p2976_p6, %p2975_p2 }
  0x2c   : > { %p2971_p1 = pneg %p2970_p10 }
  0x2e   : > { %p2978_p0 = pnand %p2977_p12, %p2971_p1 }
  0x30   : > { %2981 = shalt.err (!%p2978_p0)
}
  0x31   : > { %s3174_s18 = smov 192   ;;  %s3175_s28 = smov 12  }
  0x32   : > { %2714 = dma.hbm_to_vmem [thread:$0]  (!%p3310_p11), %s3774_s1, 3072, %s3303_s13, [#allocation6], %s3174_s18, %s3174_s18, %s3175_s28  }
  0x33   : > { %s2982_s21 = scalar_lea.hbm %s3749_s4, 4096 }
  0x34   : > { %p2983_p2 = scmp.ne.s32.totalorder %s3749_s4, %s2982_s21  ;;  %p2989_p10 = scmp.lt.u32.totalorder %s2982_s21, %s3749_s4 }
  0x36   : > { %p2985_p1 = pnand %p2983_p2, %p3324_p13 }
  0x38   : > { %p2986_p6 = pneg %p2985_p1 }
  0x3a   : > { %p2991_p3 = pnand %p2989_p10, %p2986_p6 }
  0x3c   : > { %2994 = shalt.err (!%p2991_p3)
}
  0x3d   : > { %s2995_s13 = scalar_lea.vmem %s3314_s16, 4096  ;;  %p3003_p12 = scmp.lt.s32.totalorder %s3314_s16, %s3314_s16 }
  0x3e   : > { %p2996_p5 = scmp.ne.s32.totalorder %s3314_s16, %s2995_s13  ;;  %p3004_p0 = scmp.lt.s32.totalorder %s2995_s13, %s2995_s13 }
  0x40   : > { %p2998_p7 = pnand %p2996_p5, %p3324_p13  ;;  %p3005_p2 = por %p3004_p0, %p3003_p12 }
  0x42   : > { %p2999_p9 = pneg %p2998_p7 }
  0x44   : > { %p3006_p1 = pnand %p3005_p2, %p2999_p9 }
  0x46   : > { %3009 = shalt.err (!%p3006_p1)
}
  0x47   : > { %s3176_s11 = smov 256   ;;  %s3177_s10 = smov 16  }
  0x48   : > { %2720 = dma.hbm_to_vmem [thread:$0]  (!%p3310_p11), %s3749_s4, 4096, %s3314_s16, [#allocation9], %s3176_s11, %s3176_s11, %s3177_s10  }
  0x49   : > { %s3178_s18 = smov [#allocation7]   ;;  %s3010_s26 = scalar_lea.hbm %s3747_s2, 1024 }
  0x4a   : > { %s343_s28 = sshll.u32 %s3178_s18, 4  ;;  %p3011_p6 = scmp.ne.s32.totalorder %s3747_s2, %s3010_s26  ;;  %s344_s28 = int_to_ptr.vmem [resolvable:$true] %s343_s28 }
  0x4b   : > { %p3017_p5 = scmp.lt.u32.totalorder %s3010_s26, %s3747_s2 }
  0x4c   : > { %p3013_p10 = pnand %p3011_p6, %p3324_p13 }
  0x4e   : > { %p3014_p3 = pneg %p3013_p10 }
  0x50   : > { %p3019_p7 = pnand %p3017_p5, %p3014_p3 }
  0x52   : > { %3022 = shalt.err (!%p3019_p7)
}
  0x53   : > { %s3023_s16 = scalar_lea.vmem %s344_s28, 1024  ;;  %p3031_p2 = scmp.lt.s32.totalorder %s344_s28, %s344_s28 }
  0x54   : > { %p3024_p9 = scmp.ne.s32.totalorder %s344_s28, %s3023_s16  ;;  %p3032_p1 = scmp.lt.s32.totalorder %s3023_s16, %s3023_s16 }
  0x56   : > { %p3026_p12 = pnand %p3024_p9, %p3324_p13  ;;  %p3033_p4 = por %p3032_p1, %p3031_p2 }
  0x58   : > { %p3027_p0 = pneg %p3026_p12 }
  0x5a   : > { %p3034_p8 = pnand %p3033_p4, %p3027_p0 }
  0x5c   : > { %3037 = shalt.err (!%p3034_p8)
}
  0x5d   : > { %s3179_s11 = smov 64   ;;  %s3180_s10 = smov 4  }
  0x5e   : > { %2717 = dma.hbm_to_vmem [thread:$0]  (!%p3310_p11), %s3747_s2, 1024, %s344_s28, [#allocation6], %s3179_s11, %s3179_s11, %s3180_s10  }
  0x5f   : > { %s3181_s21 = smov [#allocation10]   ;;  %s3038_s26 = scalar_lea.hbm %s3751_s6, 4096 }
  0x60   : > { %s375_s18 = sshll.u32 %s3181_s21, 4  ;;  %p3039_p4 = scmp.ne.s32.totalorder %s3751_s6, %s3038_s26  ;;  %s376_s18 = int_to_ptr.vmem [resolvable:$true] %s375_s18 }
  0x61   : > { %p3045_p10 = scmp.lt.u32.totalorder %s3038_s26, %s3751_s6 }
  0x62   : > { %p3041_p8 = pnand %p3039_p4, %p3324_p13 }
  0x64   : > { %p3042_p6 = pneg %p3041_p8 }
  0x66   : > { %p3047_p3 = pnand %p3045_p10, %p3042_p6 }
  0x68   : > { %3050 = shalt.err (!%p3047_p3)
}
  0x69   : > { %s3051_s28 = scalar_lea.vmem %s376_s18, 4096  ;;  %p3059_p12 = scmp.lt.s32.totalorder %s376_s18, %s376_s18 }
  0x6a   : > { %p3052_p5 = scmp.ne.s32.totalorder %s376_s18, %s3051_s28  ;;  %p3060_p0 = scmp.lt.s32.totalorder %s3051_s28, %s3051_s28 }
  0x6c   : > { %p3054_p7 = pnand %p3052_p5, %p3324_p13  ;;  %p3061_p2 = por %p3060_p0, %p3059_p12 }
  0x6e   : > { %p3055_p9 = pneg %p3054_p7 }
  0x70   : > { %p3062_p1 = pnand %p3061_p2, %p3055_p9 }
  0x72   : > { %3065 = shalt.err (!%p3062_p1)
}
  0x73   : > { %2723 = dma.hbm_to_vmem [thread:$0]  (!%p3310_p11), %s3751_s6, 4096, %s376_s18, [#allocation9], %s3179_s11, %s3179_s11, %s3180_s10  }
  0x74   : > { %s3405_s30 = sadd.s32 1, %s3170_s24   ;;  %s37_s21 = sadd.s32 1, %s3166_s23 }
  0x75   : > { %s34_s14 = ssub.s32 %s3170_s24, %s3405_s30  ;;  %p44_p13 = scmp.ne.s32.totalorder %s3166_s23, %s3162_s22 }
  0x76   : > { %p35_p4 = scmp.eq.s32.totalorder %s34_s14, 0  ;;  %p45_p8 = scmp.eq.s32.totalorder %s3170_s24, 0 }
  0x77   : > { %p3776_p6 = scmp.eq.s32.totalorder %s3280_s25, 1  ;;  %p2736_p3 = scmp.lt.s32.totalorder %s3170_s24, 2 }
  0x78   : > { %s3421_s20 = scalar_select %p35_p4, %s3166_s23, %s37_s21  }
  0x79   : > { %p3415_p10 = por %p3776_p6, %p44_p13  ;;  %p46_p5 = por %p45_p8, %p44_p13 }
  0x7a   : > { %s404_s26 = sand.u32 1, %s3166_s23   ;;  %s2508_s11 = sshll.u32 %s3170_s24, 8 }
  0x7b   : > { %s2379_s15 = sshll.u32 %s404_s26, 4  ;;  %s3428_s17 = scalar_lea.hbm %s3745_s0, %s2508_s11 }
  0x7c   : > { %s408_s13 = scalar_lea.vmem [#allocation2], %s2379_s15  ;;  %p3432_p11 = pnand %p2736_p3, %p46_p5 }
  0x7d   : > { %s415_s16 = sshll.u32 %s408_s13, 4  ;;  %s3436_s1 = scalar_lea.sflag [#allocation3], %s404_s26  ;;  %s3430_s16 = int_to_ptr.vmem [resolvable:$true] %s415_s16 }
  0x7e   : > { %s3066_s12 = scalar_lea.hbm %s3428_s17, 256  ;;  %p3068_p9 = pneg %p3432_p11 }
  0x7f   : > { %p3067_p7 = scmp.ne.s32.totalorder %s3428_s17, %s3066_s12  ;;  %s3071_s15 = scalar_lea.hbm %s3745_s0, 512 }
  0x80   : > { %p3072_p2 = scmp.lt.u32.totalorder %s3428_s17, %s3745_s0  ;;  %p3073_p1 = scmp.lt.u32.totalorder %s3071_s15, %s3066_s12 }
  0x81   : > { %p3069_p12 = pnand %p3068_p9, %p3067_p7  ;;  %p3075_p4 = scmp.lt.u32.totalorder %s3066_s12, %s3428_s17 }
  0x82   : > { %p3074_p13 = por %p3073_p1, %p3072_p2 }
  0x83   : > { %p3070_p0 = pneg %p3069_p12 }
  0x84   : > { %p3076_p8 = por %p3075_p4, %p3074_p13 }
  0x86   : > { %p3077_p6 = pnand %p3076_p8, %p3070_p0 }
  0x88   : > { %3080 = shalt.err (!%p3077_p6)
}
  0x89   : > { %s3081_s26 = scalar_lea.vmem %s3430_s16, 256  ;;  %s3182_s18 = smov [#allocation2]  }
  0x8a   : > { %p3082_p3 = scmp.ne.s32.totalorder %s3430_s16, %s3081_s26  ;;  %s3086_s13 = sshll.u32 %s3182_s18, 4  ;;  %s3087_s13 = int_to_ptr.vmem [resolvable:$false] %s3086_s13 }
  0x8b   : > { %s3088_s21 = scalar_lea.vmem %s3087_s13, 512  ;;  %p3089_p12 = scmp.lt.s32.totalorder %s3430_s16, %s3087_s13 }
  0x8c   : > { %p3084_p5 = pnand %p3082_p3, %p3068_p9  ;;  %p3090_p2 = scmp.lt.s32.totalorder %s3088_s21, %s3081_s26 }
  0x8e   : > { %p3085_p7 = pneg %p3084_p5  ;;  %p3091_p1 = por %p3090_p2, %p3089_p12 }
  0x90   : > { %p3092_p13 = pnand %p3091_p1, %p3085_p7 }
  0x92   : > { %3095 = shalt.err (!%p3092_p13)
}
  0x93   : > { %s3183_s12 = smov 128   ;;  %s3184_s14 = smov 8  }
  0x94   : > { %2727 = dma.hbm_to_vmem [thread:$0]  (!%p3432_p11), %s3428_s17, 256, %s3430_s16, %s3436_s1, %s3183_s12, %s3183_s12, %s3184_s14  }
  0x95   : > { %p3779_p9 = scmp.ne.s32.totalorder %s3772_s29, 0 }
  0x96   : > { %s3467_s15 = sand.u32 (!%p3779_p9), 1, %s3162_s22   ;;  %p3780_p0 = scmp.ne.s32.totalorder (!%p3779_p9), %s3769_s27, 0 }
  0x97   : > { %427 = sbr.rel (%p3779_p9) target bundleno = 4098 (0x1002), region = 68  ;;  %s2383_s11 = sshll.u32 (!%p3779_p9), %s3467_s15, 4 }
  0x98   : > { %s430_s10 = scalar_lea.sflag (!%p3779_p9), [#allocation3], %s3467_s15  ;;  %s3473_s26 = scalar_lea.vmem (!%p3779_p9), [#allocation2], %s2383_s11 }
  0x9e   : > { %3141 = dma.done.wait (%p3780_p0), %s430_s10, 256  }
  0x9f   : > { %3143 = vsyncadd (%p3780_p0), %s430_s10, 4294967040  ;;  %p3781_p11 = scmp.eq.s32.totalorder %s3280_s25, 0 }
  0xa1   : > { %3145 = dma.done.wait (%p3781_p11), [#allocation6], 4096   ;;  %p3782_p4 = pmov %p3781_p11 }
  0xa3   : > { %3147 = vsyncadd (%p3782_p4), [#allocation6], 4294963200  ;;  %p3783_p8 = pmov %p3782_p4 }
  0xa4   : > { %p3784_p6 = pmov %p3782_p4 }
  0xa5   : > { %3149 = dma.done.wait (%p3783_p8), [#allocation9], 8192  }
  0xa6   : > { %3151 = vsyncadd (%p3784_p6), [#allocation9], 4294959104  ;;  %v3185_v0 = vmov 0   ;;  %v2794_v1 = vld [vmem:[#allocation5 + $0x4] ss:$12 sps:$4 sm:$0xff]   ;;  %v3492_v18 = vld [vmem:[%s3473_s26 + $0x8] sm:$0xff]  ;;  %v738_v38 = vlaneseq }
  0xa7   : > { %686 = vmatprep.mubr.bf16.mxu0 %v3185_v0  ;;  %v2796_v2 = vld [vmem:[#allocation5] ss:$12 sps:$4 sm:$0xff]   ;;  %654 = vmatprep.subr.bf16.mxu0 %v2794_v1  ;;  %v2797_v3 = vld [vmem:[#allocation5 + $0x1c] ss:$12 sps:$4 sm:$0xff]   ;;  %v2799_v4 = vld [vmem:[#allocation5 + $0x18] ss:$12 sps:$4 sm:$0xff]  }
  0xa8   : > { %655 = vmatpush1.bf16.msra.mxu0 %v2796_v2  ;;  %v2800_v5 = vld [vmem:[#allocation5 + $0x34] ss:$12 sps:$4 sm:$0xff]   ;;  %v2802_v6 = vld [vmem:[#allocation5 + $0x30] ss:$12 sps:$4 sm:$0xff]   ;;  %v2803_v7 = vld [vmem:[#allocation5 + $0x4c] ss:$12 sps:$4 sm:$0xff]  }
  0xa9   : > { %656 = vmatprep.subr.bf16.mxu0 %v2797_v3  ;;  %v2805_v8 = vld [vmem:[#allocation5 + $0x48] ss:$12 sps:$4 sm:$0xff]   ;;  %v2806_v9 = vld [vmem:[#allocation5 + $0x64] ss:$12 sps:$4 sm:$0xff]   ;;  %v2808_v10 = vld [vmem:[#allocation5 + $0x60] ss:$12 sps:$4 sm:$0xff]  }
  0xaa   : > { %v2809_v11 = vld [vmem:[#allocation5 + $0x7c] ss:$12 sps:$4 sm:$0xff]   ;;  %v2811_v12 = vld [vmem:[#allocation5 + $0x78] ss:$12 sps:$4 sm:$0xff]   ;;  %v2812_v13 = vld [vmem:[#allocation5 + $0x94] ss:$12 sps:$4 sm:$0xff]  }
  0xab   : > { %v2814_v14 = vld [vmem:[#allocation5 + $0x90] ss:$12 sps:$4 sm:$0xff]   ;;  %v2815_v15 = vld [vmem:[#allocation5 + $0xac] ss:$12 sps:$4 sm:$0xff]   ;;  %v2817_v16 = vld [vmem:[#allocation5 + $0xa8] ss:$12 sps:$4 sm:$0xff]  }
  0xac   : > { %657 = vmatpush1.bf16.msra.mxu0 %v2799_v4  ;;  %v3489_v17 = vld [vmem:[%s3473_s26] sm:$0xff]  ;;  %v3186_v20 = vmov 0.0   ;;  %vm3187_vm0 = vmmov 0   ;;  %vm757_vm1 = vcmask 261120   ;;  %v3523_v39 = vshrl.u32 %v738_v38, 7  ;;  %s3188_s27 = smov 96  }
  0xad   : > { %658 = vmatprep.subr.bf16.mxu0 %v2800_v5  ;;  %v493_v19 = vpack.c.bf16 %v3492_v18, %v3489_v17  ;;  %2591 = vmatprep.subr.bf16.mxu1 %v3186_v20  ;;  %v2818_v30 = vld [vmem:[#allocation5 + $0x8] ss:$12 sps:$4 sm:$0xff]   ;;  %v2819_v31 = vld [vmem:[#allocation5 + $0x20] ss:$12 sps:$4 sm:$0xff]   ;;  %v2820_v32 = vld [vmem:[#allocation5 + $0x38] ss:$12 sps:$4 sm:$0xff]  }
  0xae   : > { %2607 = vmatprep.mubr.msk.bf16.mxu1 %vm3187_vm0, %v3186_v20  ;;  %2592 = vmatpush3.bf16.msra.mxu1 %v2818_v30  ;;  %v2821_v33 = vld [vmem:[#allocation5 + $0x50] ss:$12 sps:$4 sm:$0xff]   ;;  %v2822_v34 = vld [vmem:[#allocation5 + $0x68] ss:$12 sps:$4 sm:$0xff]   ;;  %v2823_v35 = vld [vmem:[#allocation5 + $0x80] ss:$12 sps:$4 sm:$0xff]  }
  0xaf   : > { %2593 = vmatprep.subr.bf16.mxu1 %v3186_v20  ;;  %v2824_v36 = vld [vmem:[#allocation5 + $0x98] ss:$12 sps:$4 sm:$0xff]   ;;  %v2825_v37 = vld [vmem:[#allocation5 + $0xb0] ss:$12 sps:$4 sm:$0xff]   ;;  %v3525_v40 = vand.u32 127, %v738_v38  ;;  %v3528_v41 = vadd.s32 8, %v3523_v39 }
  0xb0   : > { %659 = vmatpush1.bf16.msra.mxu0 %v2802_v6  ;;  %vm807_vm3 = vcmask 130048   ;;  %v2826_v2 = vld [vmem:[#allocation7] sm:$0xff]   ;;  %s3189_s29 = smov 64   ;;  %s3190_s17 = smov 32  }
  0xb1   : > { %660 = vmatprep.subr.bf16.mxu0 %v2803_v7  ;;  %vm743_vm2 = vcmp.ge.s32.totalorder %v3523_v39, %v3525_v40  ;;  %vm744_vm4 = vcmp.ge.s32.totalorder %v3528_v41, %v3525_v40  ;;  %v2832_v41 = vld [vmem:[#allocation7 + $0x30] sm:$0xff]   ;;  %s3786_s1 = sld [smem:[#allocation20_spill]]  ;;  %s2509_s18 = sshll.u32 %s3280_s25, 8 }
  0xb2   : > { %2594 = vmatpush3.bf16.msra.mxu1 %v2819_v31  ;;  %s489_s13 = scalar_lea.vmem [#allocation11], %s2383_s11  ;;  %s3787_s10 = sld [smem:[#allocation21_spill]] }
  0xb3   : > { %2595 = vmatprep.subr.bf16.mxu1 %v3186_v20  ;;  %s2261_s21 = sshll.u32 %s489_s13, 4  ;;  %s3191_s25 = smov [#allocation11]   ;;  %s3701_s21 = int_to_ptr.vmem [resolvable:$true] %s2261_s21 }
  0xb4   : > { %661 = vmatpush1.bf16.msra.mxu0 %v2805_v8  ;;  %s3100_s11 = sshll.u32 %s3191_s25, 4  ;;  %s3101_s11 = int_to_ptr.vmem [resolvable:$false] %s3100_s11 }
  0xb5   : > { %662 = vmatprep.subr.bf16.mxu0 %v2806_v9  ;;  %p3103_p12 = scmp.lt.s32.totalorder %s3701_s21, %s3101_s11 }
  0xb6   : > { %2596 = vmatpush3.bf16.msra.mxu1 %v2820_v32 }
  0xb7   : > { %2597 = vmatprep.subr.bf16.mxu1 %v3186_v20 }
  0xb8   : > { %663 = vmatpush1.bf16.msra.mxu0 %v2808_v10  ;;  %s3699_s26 = scalar_lea.hbm %s3787_s10, %s2509_s18 }
  0xb9   : > { %664 = vmatprep.subr.bf16.mxu0 %v2809_v11 }
  0xba   : > { %2598 = vmatpush3.bf16.msra.mxu1 %v2821_v33 }
  0xbb   : > { %2599 = vmatprep.subr.bf16.mxu1 %v3186_v20 }
  0xbc   : > { %665 = vmatpush1.bf16.msra.mxu0 %v2811_v12 }
  0xbd   : > { %666 = vmatprep.subr.bf16.mxu0 %v2812_v13  ;;  %v2827_v13 = vld [vmem:[#allocation7 + $0x8] sm:$0xff]  }
  0xbe   : > { %2600 = vmatpush3.bf16.msra.mxu1 %v2822_v34 }
  0xbf   : > { %2601 = vmatprep.subr.bf16.mxu1 %v3186_v20 }
  0xc0   : > { %667 = vmatpush1.bf16.msra.mxu0 %v2814_v14 }
  0xc1   : > { %668 = vmatprep.subr.bf16.mxu0 %v2815_v15 }
  0xc2   : > { %2602 = vmatpush3.bf16.msra.mxu1 %v2823_v35 }
  0xc3   : > { %2603 = vmatprep.subr.bf16.mxu1 %v3186_v20 }
  0xc4   : > { %669 = vmatpush1.bf16.msra.mxu0 %v2817_v16 }
  0xc5   : > { %2611 = vmatprep.subr.bf16.mxu0 %v3186_v20 }
  0xc6   : > { %2604 = vmatpush3.bf16.msra.mxu1 %v2824_v36 }
  0xc7   : > { %687 = vmatmul.mubr.bf16.vlgmr.msra.gmra.mrb[0].mxu0 %v493_v19  ;;  %2605 = vmatprep.subr.bf16.mxu1 %v3186_v20 }
  0xc8   : > { %2613 = vmatprep.mubr.msk.bf16.mxu0 %vm3187_vm0, %v3186_v20 }
  0xca   : > { %2606 = vmatpush3.bf16.msra.mxu1 %v2825_v37 }
  0xcb   : > { %2617 = vmatprep.subr.bf16.mxu1 %v3186_v20 }
  0xcd   : > { %2608 = vmatmul.mubr.bf16.vlgmr.msra.gmra.mrb[0].mxu1 %v493_v19 }
  0xce   : > { %2619 = vmatprep.mubr.msk.bf16.mxu1 %vm3187_vm0, %v3186_v20 }
 0x19a   : > { %v688_v21 = vpop.f32.mrb[0].mxu0 }
 0x19b   : > { %v690_v22 = vpop.f32.mrb[1].mxu0  ;;  %v752_v24 = vmul.f32 0.17677669, %v688_v21 }
 0x19c   : > { %v692_v23 = vpop.f32.mrb[2].mxu0 }
 0x19d   : > { %v753_v25 = vmul.f32 0.17677669, %v692_v23  ;;  %v694_v26 = vpop.f32.mrb[3].mxu0 }
 0x19e   : > { %v3502_v27 = vpack.c.bf16 %v694_v26, %v690_v22 }
 0x19f   : > { %v3504_v28 = vpack.c.bf16 %v753_v25, %v752_v24 }
 0x1a0   : > { %v762_v29 = vsel %vm757_vm1, %v3502_v27, 0  ;;  %v731_v60 = vpop.f32.mrb[0].mxu1 }
 0x1a1   : > { %2612 = vmatpush3.bf16.xpose.msra.mxu0 %v762_v29  ;;  %v2609_v61 = vpop.f32.mrb[1].mxu1 }
 0x1a2   : > { %2623 = vmatprep.subr.bf16.mxu0 %v3186_v20  ;;  %v734_v62 = vpop.f32.mrb[2].mxu1  ;;  %v2829_v61 = vld [vmem:[#allocation7 + $0x18] sm:$0xff]  }
 0x1a3   : > { %v2610_v63 = vpop.f32.mrb[3].mxu1  ;;  %v3548_v1 = vpack.c.bf16 %v734_v62, %v731_v60 }
 0x1a5   : > { %2618 = vmatpush3.bf16.msra.mxu1 %v3548_v1 }
 0x1a6   : > { %2631 = vmatprep.subr.bf16.mxu1 %v3186_v20 }
 0x1a8   : > { %2614 = vmatmul.mubr.msk.bf16.vlgmr.msra.gmra.mrb[4].mxu0 %vm757_vm1, %v3504_v28 }
 0x1a9   : > { %2627 = vmatprep.mubr.msk.bf16.mxu0 %vm3187_vm0, %v3186_v20  ;;  %2624 = vmatpush3.bf16.msra.mxu0 %v2826_v2 }
 0x1aa   : > { %2625 = vmatprep.subr.bf16.mxu0 %v3186_v20 }
 0x1ad   : > { %2626 = vmatpush3.bf16.msra.mxu0 %v2827_v13 }
 0x1ae   : > { %2637 = vmatprep.subr.bf16.mxu0 %v3186_v20 }
 0x27b   : > { %v798_v42 = vpop.f32.mrb[4].mxu0 }
 0x27c   : > { %v805_v43 = vsel %vm743_vm2, %v798_v42, -1e+30  ;;  %v2615_v44 = vpop.f32.mrb[5].mxu0 }
 0x27d   : > { %v801_v45 = vpop.f32.mrb[6].mxu0  ;;  %v808_v46 = vsel %vm807_vm3, %v805_v43, -inf }
 0x27e   : > { %v806_v47 = vsel %vm744_vm4, %v801_v45, -1e+30  ;;  %809 = vmax.xlane.f32.xlu0 %v808_v46  ;;  %v2616_v48 = vpop.f32.mrb[7].mxu0  ;;  %v2828_v45 = vld [vmem:[#allocation7 + $0x10] sm:$0xff]  }
 0x27f   : > { %v811_v49 = vsel %vm807_vm3, %v806_v47, -inf }
 0x282   : > { %812 = vmax.xlane.f32.xlu0 %v811_v49 }
 0x298   : > { %942 = vrot.lane.b32.xlu0 %v3502_v27, %s3188_s27 }
 0x30b   : > { %v810_v50 = vpop.xlane.xlu0 %809 }
 0x30c   : > { %v814_v51 = vsub.f32 %v805_v43, %v810_v50 }
 0x30e   : > { %v816_v52 = vmul.f32 1.442695, %v814_v51 }
 0x30f   : > { %v813_v53 = vpop.xlane.xlu0 %812 }
 0x310   : > { %2914 = vpow2.f32 %v816_v52  ;;  %v815_v54 = vsub.f32 %v806_v47, %v813_v53 }
 0x312   : > { %v818_v55 = vmul.f32 1.442695, %v815_v54 }
 0x313   : > { %v943_v9 = vpop.permute.xlu0 %942 }
 0x314   : > { %2916 = vpow2.f32 %v818_v55  ;;  %v948_v11 = vsel %vm757_vm1, %v943_v9, 0 }
 0x31a   : > { %v2915_v56 = vpop.eup %2914 }
 0x31b   : > { %v820_v57 = vsel %vm807_vm3, %v2915_v56, 0.0 }
 0x31c   : > { %821 = vadd.xlane.f32.xlu1 %v820_v57 }
 0x31e   : > { %v2917_v58 = vpop.eup %2916 }
 0x31f   : > { %v823_v59 = vsel %vm807_vm3, %v2917_v58, 0.0 }
 0x320   : > { %824 = vadd.xlane.f32.xlu1 %v823_v59 }
 0x331   : > { %939 = vrot.lane.b32.xlu1 %v3504_v28, %s3188_s27 }
 0x3a9   : > { %v822_v3 = vpop.xlane.xlu1 %821 }
 0x3aa   : > { %2918 = vrcp.f32 %v822_v3 }
 0x3ad   : > { %v825_v4 = vpop.xlane.xlu1 %824 }
 0x3ae   : > { %2920 = vrcp.f32 %v825_v4 }
 0x3b1   : > { %v940_v12 = vpop.permute.xlu1 %939 }
 0x3b4   : > { %v2919_v5 = vpop.eup %2918 }
 0x3b5   : > { %v828_v7 = vmul.f32 %v2919_v5, %v2915_v56 }
 0x3b8   : > { %v2921_v6 = vpop.eup %2920 }
 0x3b9   : > { %v829_v8 = vmul.f32 %v2921_v6, %v2917_v58 }
 0x3bb   : > { %v830_v10 = vpack.c.bf16 %v829_v8, %v828_v7 }
 0x3bd   : > { %2620 = vmatmul.mubr.msk.bf16.vlgmr.msra.gmra.mrb[4].mxu1 %vm807_vm3, %v830_v10 }
 0x3be   : > { %2632 = vmatpush3.bf16.xpose.msra.mxu1 %v948_v11  ;;  %2633 = vmatprep.mubr.msk.bf16.mxu1 %vm3187_vm0, %v3186_v20 }
 0x3bf   : > { %2643 = vmatprep.subr.bf16.mxu1 %v3186_v20 }
 0x3c5   : > { %2634 = vmatmul.mubr.msk.bf16.vlgmr.msra.gmra.mrb[8].mxu1 %vm757_vm1, %v940_v12 }
 0x3c6   : > { %2647 = vmatprep.mubr.msk.bf16.mxu1 %vm3187_vm0, %v3186_v20  ;;  %2644 = vmatpush3.bf16.msra.mxu1 %v2828_v45 }
 0x3c7   : > { %2645 = vmatprep.subr.bf16.mxu1 %v3186_v20 }
 0x3ca   : > { %2646 = vmatpush3.bf16.msra.mxu1 %v2829_v61 }
 0x3cb   : > { %2657 = vmatprep.subr.bf16.mxu1 %v3186_v20 }
 0x490   : > { %v868_v14 = vpop.f32.mrb[4].mxu1 }
 0x491   : > { %v2621_v15 = vpop.f32.mrb[5].mxu1 }
 0x492   : > { %v871_v16 = vpop.f32.mrb[6].mxu1 }
 0x493   : > { %v875_v19 = vpack.c.bf16 %v871_v16, %v868_v14  ;;  %v2622_v21 = vpop.f32.mrb[7].mxu1 }
 0x495   : > { %2628 = vmatmul.mubr.msk.bf16.vlgmr.msra.gmra.mrb[8].mxu0 %vm757_vm1, %v875_v19 }
 0x496   : > { %2639 = vmatprep.mubr.msk.bf16.mxu0 %vm3187_vm0, %v3186_v20 }
 0x498   : > { %v984_v22 = vpop.f32.mrb[8].mxu1 }
 0x499   : > { %v991_v23 = vsel %vm743_vm2, %v984_v22, -1e+30  ;;  %v2635_v24 = vpop.f32.mrb[9].mxu1 }
 0x49a   : > { %v987_v25 = vpop.f32.mrb[10].mxu1  ;;  %v993_v26 = vsel %vm807_vm3, %v991_v23, -inf }
 0x49b   : > { %v992_v29 = vsel %vm744_vm4, %v987_v25, -1e+30  ;;  %994 = vmax.xlane.f32.xlu1 %v993_v26  ;;  %v2636_v30 = vpop.f32.mrb[11].mxu1 }
 0x49c   : > { %v996_v31 = vsel %vm807_vm3, %v992_v29, -inf }
 0x49d   : > { %997 = vmax.xlane.f32.xlu0 %v996_v31 }
 0x528   : > { %v995_v32 = vpop.xlane.xlu1 %994 }
 0x529   : > { %v999_v33 = vsub.f32 %v991_v23, %v995_v32 }
 0x52a   : > { %v998_v34 = vpop.xlane.xlu0 %997 }
 0x52b   : > { %v1001_v35 = vmul.f32 1.442695, %v999_v33  ;;  %v1000_v36 = vsub.f32 %v992_v29, %v998_v34  ;;  %v2413_v29 = vld [vmem:[%s3748_s3] ss:$0 sm:$0xff] }
 0x52d   : > { %2922 = vpow2.f32 %v1001_v35  ;;  %v1003_v37 = vmul.f32 1.442695, %v1000_v36 }
 0x52f   : > { %2924 = vpow2.f32 %v1003_v37 }
 0x537   : > { %v2923_v38 = vpop.eup %2922 }
 0x538   : > { %v1005_v42 = vsel %vm807_vm3, %v2923_v38, 0.0 }
 0x539   : > { %v2925_v43 = vpop.eup %2924  ;;  %1006 = vadd.xlane.f32.xlu0 %v1005_v42 }
 0x53a   : > { %v1008_v44 = vsel %vm807_vm3, %v2925_v43, 0.0 }
 0x53b   : > { %1009 = vadd.xlane.f32.xlu1 %v1008_v44 }
 0x54c   : > { %1130 = vrot.lane.b32.xlu1 %v3502_v27, %s3189_s29 }
 0x54f   : > { %1017 = vrot.lane.b32.xlu0 %v3548_v1, %s3188_s27  ;;  %s2248_s27 = scalar_lea.sflag [#allocation4], %s3467_s15 }
 0x550   : > { %1128 = vrot.lane.b32.xlu1 %v3504_v28, %s3189_s29 }
 0x568   : > { %v3582_v46 = vpop.f32.mrb[8].mxu0 }
 0x569   : > { %v2629_v47 = vpop.f32.mrb[9].mxu0  ;;  %v936_v30 = vadd.f32 %v2413_v29, %v3582_v46 }
 0x56a   : > { %v3584_v48 = vpop.f32.mrb[10].mxu0 }
 0x56b   : > { %v2630_v49 = vpop.f32.mrb[11].mxu0  ;;  %v937_v32 = vadd.f32 %v2413_v29, %v3584_v48 }
 0x5c6   : > { %v1007_v50 = vpop.xlane.xlu0 %1006 }
 0x5c7   : > { %2926 = vrcp.f32 %v1007_v50  ;;  %v2831_v50 = vld [vmem:[#allocation7 + $0x28] sm:$0xff]  }
 0x5c8   : > { %v1010_v51 = vpop.xlane.xlu1 %1009 }
 0x5c9   : > { %2928 = vrcp.f32 %v1010_v51 }
 0x5ca   : > { %v1018_v52 = vpop.permute.xlu0 %1017 }
 0x5cb   : > { %2638 = vmatpush3.bf16.msra.mxu0 %v1018_v52 }
 0x5cc   : > { %2651 = vmatprep.subr.bf16.mxu0 %v3186_v20  ;;  %v1131_v57 = vpop.permute.xlu1 %1130 }
 0x5cd   : > { %v1136_v59 = vsel %vm757_vm1, %v1131_v57, 0 }
 0x5d0   : > { %v1129_v60 = vpop.permute.xlu1 %1128 }
 0x5d1   : > { %v2927_v53 = vpop.eup %2926 }
 0x5d2   : > { %v1013_v55 = vmul.f32 %v2927_v53, %v2923_v38 }
 0x5d3   : > { %v2929_v54 = vpop.eup %2928 }
 0x5d4   : > { %v1014_v56 = vmul.f32 %v2929_v54, %v2925_v43 }
 0x5d6   : > { %v1015_v58 = vpack.c.bf16 %v1014_v56, %v1013_v55 }
 0x5d8   : > { %2640 = vmatmul.mubr.msk.bf16.vlgmr.msra.gmra.mrb[12].mxu0 %vm807_vm3, %v1015_v58 }
 0x5d9   : > { %2652 = vmatpush3.bf16.xpose.msra.mxu0 %v1136_v59  ;;  %2653 = vmatprep.mubr.msk.bf16.mxu0 %vm3187_vm0, %v3186_v20 }
 0x5da   : > { %2663 = vmatprep.subr.bf16.mxu0 %v3186_v20 }
 0x5e0   : > { %2654 = vmatmul.mubr.msk.bf16.vlgmr.msra.gmra.mrb[16].mxu0 %vm757_vm1, %v1129_v60 }
 0x5e1   : > { %2667 = vmatprep.mubr.msk.bf16.mxu0 %vm3187_vm0, %v3186_v20 }
 0x6ab   : > { %v1057_v62 = vpop.f32.mrb[12].mxu0 }
 0x6ac   : > { %v2641_v63 = vpop.f32.mrb[13].mxu0 }
 0x6ad   : > { %v1060_v2 = vpop.f32.mrb[14].mxu0 }
 0x6ae   : > { %v1064_v3 = vpack.c.bf16 %v1060_v2, %v1057_v62  ;;  %v2642_v4 = vpop.f32.mrb[15].mxu0 }
 0x6b0   : > { %2648 = vmatmul.mubr.msk.bf16.vlgmr.msra.gmra.mrb[12].mxu1 %vm757_vm1, %v1064_v3 }
 0x6b1   : > { %2659 = vmatprep.mubr.msk.bf16.mxu1 %vm3187_vm0, %v3186_v20 }
 0x6b3   : > { %v1172_v5 = vpop.f32.mrb[16].mxu0 }
 0x6b4   : > { %v1179_v6 = vsel %vm743_vm2, %v1172_v5, -1e+30  ;;  %v2655_v7 = vpop.f32.mrb[17].mxu0 }
 0x6b5   : > { %v1175_v8 = vpop.f32.mrb[18].mxu0  ;;  %v1181_v9 = vsel %vm807_vm3, %v1179_v6, -inf }
 0x6b6   : > { %v1180_v10 = vsel %vm744_vm4, %v1175_v8, -1e+30  ;;  %1182 = vmax.xlane.f32.xlu1 %v1181_v9  ;;  %v2656_v11 = vpop.f32.mrb[19].mxu0 }
 0x6b7   : > { %v1184_v12 = vsel %vm807_vm3, %v1180_v10, -inf }
 0x6b8   : > { %1185 = vmax.xlane.f32.xlu0 %v1184_v12 }
 0x6c7   : > { %1204 = vrot.lane.b32.xlu1 %v3548_v1, %s3189_s29  ;;  %s3096_s29 = scalar_lea.vmem %s3701_s21, 256 }
 0x6c8   : > { %p3097_p3 = scmp.ne.s32.totalorder %s3701_s21, %s3096_s29 }
 0x6ca   : > { %p3098_p5 = pnand %p3097_p3, %p3415_p10 }
 0x6cb   : > { %1315 = vrot.lane.b32.xlu1 %v3504_v28, %s3190_s17  ;;  %v2830_v28 = vld [vmem:[#allocation7 + $0x20] sm:$0xff]  }
 0x6cc   : > { %2664 = vmatpush3.bf16.msra.mxu0 %v2830_v28  ;;  %p3099_p7 = pneg %p3098_p5 }
 0x6cd   : > { %2665 = vmatprep.subr.bf16.mxu0 %v3186_v20 }
 0x6d0   : > { %2666 = vmatpush3.bf16.msra.mxu0 %v2831_v50 }
 0x6d1   : > { %2677 = vmatprep.subr.bf16.mxu0 %v3186_v20 }
 0x743   : > { %v1183_v13 = vpop.xlane.xlu1 %1182 }
 0x744   : > { %v1187_v14 = vsub.f32 %v1179_v6, %v1183_v13 }
 0x745   : > { %v1186_v15 = vpop.xlane.xlu0 %1185 }
 0x746   : > { %v1189_v16 = vmul.f32 1.442695, %v1187_v14  ;;  %v1188_v19 = vsub.f32 %v1180_v10, %v1186_v15 }
 0x747   : > { %v1205_v21 = vpop.permute.xlu1 %1204 }
 0x748   : > { %2930 = vpow2.f32 %v1189_v16  ;;  %v1191_v22 = vmul.f32 1.442695, %v1188_v19  ;;  %2658 = vmatpush3.bf16.msra.mxu1 %v1205_v21 }
 0x749   : > { %2671 = vmatprep.subr.bf16.mxu1 %v3186_v20 }
 0x74a   : > { %2932 = vpow2.f32 %v1191_v22 }
 0x74b   : > { %v1316_v48 = vpop.permute.xlu1 %1315 }
 0x752   : > { %v2931_v23 = vpop.eup %2930 }
 0x753   : > { %v1193_v24 = vsel %vm807_vm3, %v2931_v23, 0.0 }
 0x754   : > { %v2933_v25 = vpop.eup %2932  ;;  %1194 = vadd.xlane.f32.xlu0 %v1193_v24 }
 0x755   : > { %v1196_v26 = vsel %vm807_vm3, %v2933_v25, 0.0 }
 0x758   : > { %1197 = vadd.xlane.f32.xlu0 %v1196_v26 }
 0x76e   : > { %1317 = vrot.lane.b32.xlu0 %v3502_v27, %s3190_s17 }
 0x783   : > { %v1119_v31 = vpop.f32.mrb[12].mxu1 }
 0x784   : > { %v1126_v33 = vadd.f32 %v1119_v31, %v936_v30  ;;  %v2649_v34 = vpop.f32.mrb[13].mxu1 }
 0x785   : > { %v1122_v35 = vpop.f32.mrb[14].mxu1 }
 0x786   : > { %v1127_v36 = vadd.f32 %v1122_v35, %v937_v32  ;;  %v2650_v37 = vpop.f32.mrb[15].mxu1 }
 0x7e1   : > { %v1195_v38 = vpop.xlane.xlu0 %1194 }
 0x7e2   : > { %2934 = vrcp.f32 %v1195_v38 }
 0x7e5   : > { %v1198_v27 = vpop.xlane.xlu0 %1197 }
 0x7e6   : > { %2936 = vrcp.f32 %v1198_v27 }
 0x7e9   : > { %v1318_v47 = vpop.permute.xlu0 %1317 }
 0x7ea   : > { %v1323_v46 = vsel %vm757_vm1, %v1318_v47, 0  ;;  %v2839_v47 = vld [vmem:[#allocation8 + $0xc] ss:$16 sps:$4 sm:$0xff]  }
 0x7ec   : > { %v2935_v42 = vpop.eup %2934 }
 0x7ed   : > { %v1201_v44 = vmul.f32 %v2935_v42, %v2931_v23 }
 0x7f0   : > { %v2937_v43 = vpop.eup %2936 }
 0x7f1   : > { %v1202_v45 = vmul.f32 %v2937_v43, %v2933_v25  ;;  %v2834_v43 = vld [vmem:[#allocation8] ss:$16 sps:$4 sm:$0xff]  }
 0x7f3   : > { %v1203_v49 = vpack.c.bf16 %v1202_v45, %v1201_v44  ;;  %v2836_v44 = vld [vmem:[#allocation8 + $0x4] ss:$16 sps:$4 sm:$0xff]   ;;  %v2837_v45 = vld [vmem:[#allocation8 + $0x8] ss:$16 sps:$4 sm:$0xff]  }
 0x7f5   : > { %2660 = vmatmul.mubr.msk.bf16.vlgmr.msra.gmra.mrb[16].mxu1 %vm807_vm3, %v1203_v49  ;;  %v2842_v49 = vld [vmem:[#allocation8 + $0x24] ss:$16 sps:$4 sm:$0xff]  }
 0x7f6   : > { %2672 = vmatpush3.bf16.xpose.msra.mxu1 %v1323_v46  ;;  %2673 = vmatprep.mubr.msk.bf16.mxu1 %vm3187_vm0, %v3186_v20  ;;  %v2845_v46 = vld [vmem:[#allocation8 + $0x2c] ss:$16 sps:$4 sm:$0xff]  }
 0x7f7   : > { %2683 = vmatprep.subr.bf16.mxu1 %v3186_v20 }
 0x7fd   : > { %2674 = vmatmul.mubr.msk.bf16.vlgmr.msra.gmra.mrb[20].mxu1 %vm757_vm1, %v1316_v48  ;;  %v2843_v48 = vld [vmem:[#allocation8 + $0x28] ss:$16 sps:$4 sm:$0xff]  }
 0x7fe   : > { %2687 = vmatprep.mubr.msk.bf16.mxu1 %vm3187_vm0, %v3186_v20  ;;  %2684 = vmatpush3.bf16.msra.mxu1 %v2832_v41  ;;  %v2870_v41 = vld [vmem:[#allocation8 + $0xc0] ss:$16 sps:$4 sm:$0xff]  }
 0x7ff   : > { %2685 = vmatprep.subr.bf16.mxu1 %v3186_v20 }
 0x8c8   : > { %v1244_v51 = vpop.f32.mrb[16].mxu1 }
 0x8c9   : > { %v2661_v52 = vpop.f32.mrb[17].mxu1 }
 0x8ca   : > { %v1247_v53 = vpop.f32.mrb[18].mxu1 }
 0x8cb   : > { %v1251_v54 = vpack.c.bf16 %v1247_v53, %v1244_v51  ;;  %v2662_v55 = vpop.f32.mrb[19].mxu1 }
 0x8cd   : > { %2668 = vmatmul.mubr.msk.bf16.vlgmr.msra.gmra.mrb[20].mxu0 %vm757_vm1, %v1251_v54 }
 0x8ce   : > { %2679 = vmatprep.mubr.msk.bf16.mxu0 %vm3187_vm0, %v3186_v20  ;;  %v2833_v20 = vld [vmem:[#allocation7 + $0x38] sm:$0xff]  }
 0x8cf   : > { %2686 = vmatpush3.bf16.msra.mxu1 %v2833_v20 }
 0x8d0   : > { %v1359_v56 = vpop.f32.mrb[20].mxu1  ;;  %1803 = vmatprep.subr.bf16.mxu1 %v2839_v47  ;;  %v2891_v47 = vld [vmem:[#allocation10 + $0xd0] sm:$0xff]  }
 0x8d1   : > { %v1366_v57 = vsel %vm743_vm2, %v1359_v56, -1e+30  ;;  %v2675_v58 = vpop.f32.mrb[21].mxu1  ;;  %v2848_v56 = vld [vmem:[#allocation8 + $0x44] ss:$16 sps:$4 sm:$0xff]  }
 0x8d2   : > { %v1362_v59 = vpop.f32.mrb[22].mxu1  ;;  %v1368_v60 = vsel %vm807_vm3, %v1366_v57, -inf  ;;  %v2846_v58 = vld [vmem:[#allocation8 + $0x40] ss:$16 sps:$4 sm:$0xff]  }
 0x8d3   : > { %v1367_v61 = vsel %vm744_vm4, %v1362_v59, -1e+30  ;;  %1369 = vmax.xlane.f32.xlu1 %v1368_v60  ;;  %v2676_v62 = vpop.f32.mrb[23].mxu1  ;;  %v2849_v59 = vld [vmem:[#allocation8 + $0x48] ss:$16 sps:$4 sm:$0xff]  }
 0x8d4   : > { %v1371_v63 = vsel %vm807_vm3, %v1367_v61, -inf  ;;  %v2854_v60 = vld [vmem:[#allocation8 + $0x64] ss:$16 sps:$4 sm:$0xff]   ;;  %v2852_v62 = vld [vmem:[#allocation8 + $0x60] ss:$16 sps:$4 sm:$0xff]  }
 0x8d5   : > { %1372 = vmax.xlane.f32.xlu0 %v1371_v63  ;;  %v2855_v63 = vld [vmem:[#allocation8 + $0x68] ss:$16 sps:$4 sm:$0xff]  }
 0x960   : > { %v1370_v2 = vpop.xlane.xlu1 %1369 }
 0x961   : > { %v1374_v3 = vsub.f32 %v1366_v57, %v1370_v2  ;;  %v2851_v57 = vld [vmem:[#allocation8 + $0x4c] ss:$16 sps:$4 sm:$0xff]   ;;  %v2860_v2 = vld [vmem:[#allocation8 + $0x84] ss:$16 sps:$4 sm:$0xff]  }
 0x962   : > { %v1373_v4 = vpop.xlane.xlu0 %1372 }
 0x963   : > { %v1376_v5 = vmul.f32 1.442695, %v1374_v3  ;;  %v1375_v6 = vsub.f32 %v1367_v61, %v1373_v4  ;;  %v2857_v61 = vld [vmem:[#allocation8 + $0x6c] ss:$16 sps:$4 sm:$0xff]   ;;  %v2858_v4 = vld [vmem:[#allocation8 + $0x80] ss:$16 sps:$4 sm:$0xff]  }
 0x964   : > { %v2863_v3 = vld [vmem:[#allocation8 + $0x8c] ss:$16 sps:$4 sm:$0xff]  }
 0x965   : > { %2938 = vpow2.f32 %v1376_v5  ;;  %v1378_v7 = vmul.f32 1.442695, %v1375_v6  ;;  %v2861_v5 = vld [vmem:[#allocation8 + $0x88] ss:$16 sps:$4 sm:$0xff]   ;;  %v2866_v6 = vld [vmem:[#allocation8 + $0xa4] ss:$16 sps:$4 sm:$0xff]  }
 0x967   : > { %2940 = vpow2.f32 %v1378_v7  ;;  %v2869_v7 = vld [vmem:[#allocation8 + $0xac] ss:$16 sps:$4 sm:$0xff]  }
 0x96f   : > { %v2939_v8 = vpop.eup %2938 }
 0x970   : > { %v1380_v9 = vsel %vm807_vm3, %v2939_v8, 0.0 }
 0x971   : > { %v2941_v10 = vpop.eup %2940  ;;  %1381 = vadd.xlane.f32.xlu0 %v1380_v9  ;;  %v2867_v9 = vld [vmem:[#allocation8 + $0xa8] ss:$16 sps:$4 sm:$0xff]  }
 0x972   : > { %v1383_v40 = vsel %vm807_vm3, %v2941_v10, 0.0 }
 0x973   : > { %1384 = vadd.xlane.f32.xlu1 %v1383_v40  ;;  %v2875_v40 = vld [vmem:[#allocation8 + $0xcc] ss:$16 sps:$4 sm:$0xff]  }
 0x987   : > { %1391 = vrot.lane.b32.xlu0 %v3548_v1, %s3190_s17  ;;  %s3785_s17 = sld [smem:[#allocation19_spill]] }
 0x9a0   : > { %v1306_v11 = vpop.f32.mrb[20].mxu0 }
 0x9a1   : > { %v1313_v12 = vadd.f32 %v1306_v11, %v1126_v33  ;;  %v2669_v13 = vpop.f32.mrb[21].mxu0  ;;  %v2873_v11 = vld [vmem:[#allocation8 + $0xc8] ss:$16 sps:$4 sm:$0xff]  }
 0x9a2   : > { %v1309_v14 = vpop.f32.mrb[22].mxu0  ;;  %v2881_v13 = vld [vmem:[#allocation8 + $0xec] ss:$16 sps:$4 sm:$0xff]  }
 0x9a3   : > { %v1314_v15 = vadd.f32 %v1309_v14, %v1127_v36  ;;  %v2670_v16 = vpop.f32.mrb[23].mxu0  ;;  %v2876_v14 = vld [vmem:[#allocation8 + $0xe0] ss:$16 sps:$4 sm:$0xff]  }
 0x9a4   : > { %v2882_v16 = vld [vmem:[#allocation10 + $0x40] sm:$0xff]  }
 0x9fe   : > { %v1382_v19 = vpop.xlane.xlu0 %1381 }
 0x9ff   : > { %2942 = vrcp.f32 %v1382_v19  ;;  %v2883_v19 = vld [vmem:[#allocation10 + $0xc0] sm:$0xff]  }
 0xa00   : > { %v1385_v21 = vpop.xlane.xlu1 %1384 }
 0xa01   : > { %2944 = vrcp.f32 %v1385_v21 }
 0xa02   : > { %v1392_v22 = vpop.permute.xlu0 %1391 }
 0xa03   : > { %2678 = vmatpush3.bf16.msra.mxu0 %v1392_v22 }
 0xa04   : > { %1760 = vmatprep.subr.bf16.mxu0 %v2836_v44  ;;  %v2889_v44 = vld [vmem:[#allocation10 + $0x88] sm:$0xff]  }
 0xa09   : > { %v2943_v23 = vpop.eup %2942 }
 0xa0a   : > { %v1388_v25 = vmul.f32 %v2943_v23, %v2939_v8  ;;  %v2864_v8 = vld [vmem:[#allocation8 + $0xa0] ss:$16 sps:$4 sm:$0xff]  }
 0xa0b   : > { %v2945_v24 = vpop.eup %2944 }
 0xa0c   : > { %v1389_v1 = vmul.f32 %v2945_v24, %v2941_v10  ;;  %v2872_v10 = vld [vmem:[#allocation8 + $0xc4] ss:$16 sps:$4 sm:$0xff]  }
 0xa0e   : > { %v1390_v26 = vpack.c.bf16 %v1389_v1, %v1388_v25 }
 0xa10   : > { %2680 = vmatmul.mubr.msk.bf16.vlgmr.msra.gmra.mrb[24].mxu0 %vm807_vm3, %v1390_v26 }
 0xa11   : > { %1792 = vmatprep.mubr.bf16.mxu0 %v3185_v0  ;;  %1761 = vmatpush1.bf16.msra.mxu0 %v2834_v43  ;;  %v2888_v43 = vld [vmem:[#allocation10 + $0x8] sm:$0xff]  }
 0xa12   : > { %1762 = vmatprep.subr.bf16.mxu0 %v2842_v49  ;;  %v2892_v49 = vld [vmem:[#allocation10 + $0x10] sm:$0xff]  }
 0xae3   : > { %v1431_v28 = vpop.f32.mrb[24].mxu0 }
 0xae4   : > { %v2681_v29 = vpop.f32.mrb[25].mxu0 }
 0xae5   : > { %v1434_v30 = vpop.f32.mrb[26].mxu0 }
 0xae6   : > { %v1438_v31 = vpack.c.bf16 %v1434_v30, %v1431_v28  ;;  %v2682_v32 = vpop.f32.mrb[27].mxu0  ;;  %v2434_v28 = vld [vmem:[%s3753_s8] ss:$0 sm:$0xff] }
 0xae7   : > { %v2435_v32 = vld [vmem:[%s3754_s9] ss:$0 sm:$0xff] }
 0xae8   : > { %2688 = vmatmul.mubr.msk.bf16.vlgmr.msra.gmra.mrb[24].mxu1 %vm757_vm1, %v1438_v31 }
 0xae9   : > { %1835 = vmatprep.mubr.bf16.mxu1 %v3185_v0  ;;  %v2840_v0 = vld [vmem:[#allocation8 + $0x20] ss:$16 sps:$4 sm:$0xff]   ;;  %1804 = vmatpush1.bf16.msra.mxu1 %v2837_v45 }
 0xaea   : > { %1805 = vmatprep.subr.bf16.mxu1 %v2845_v46  ;;  %1763 = vmatpush1.bf16.msra.mxu0 %v2840_v0  ;;  %v2890_v45 = vld [vmem:[#allocation10 + $0x50] sm:$0xff]   ;;  %v2894_v0 = vld [vmem:[#allocation10 + $0x58] sm:$0xff]  }
 0xaeb   : > { %1764 = vmatprep.subr.bf16.mxu0 %v2848_v56  ;;  %v2893_v46 = vld [vmem:[#allocation10 + $0x90] sm:$0xff]   ;;  %v2904_v56 = vld [vmem:[#allocation10 + $0x28] sm:$0xff]  }
 0xaed   : > { %1806 = vmatpush1.bf16.msra.mxu1 %v2843_v48  ;;  %v2895_v48 = vld [vmem:[#allocation10 + $0xd8] sm:$0xff]  }
 0xaee   : > { %1807 = vmatprep.subr.bf16.mxu1 %v2851_v57  ;;  %1765 = vmatpush1.bf16.msra.mxu0 %v2846_v58  ;;  %v2905_v57 = vld [vmem:[#allocation10 + $0xa8] sm:$0xff]   ;;  %v2906_v58 = vld [vmem:[#allocation10 + $0x70] sm:$0xff]  }
 0xaef   : > { %1766 = vmatprep.subr.bf16.mxu0 %v2854_v60  ;;  %v2908_v60 = vld [vmem:[#allocation10 + $0x30] sm:$0xff]  }
 0xaf1   : > { %1808 = vmatpush1.bf16.msra.mxu1 %v2849_v59  ;;  %v2907_v59 = vld [vmem:[#allocation10 + $0xf0] sm:$0xff]  }
 0xaf2   : > { %1809 = vmatprep.subr.bf16.mxu1 %v2857_v61  ;;  %1767 = vmatpush1.bf16.msra.mxu0 %v2852_v62  ;;  %v2909_v61 = vld [vmem:[#allocation10 + $0xb0] sm:$0xff]   ;;  %v2910_v62 = vld [vmem:[#allocation10 + $0x78] sm:$0xff]  }
 0xaf3   : > { %1768 = vmatprep.subr.bf16.mxu0 %v2860_v2  ;;  %v2912_v2 = vld [vmem:[#allocation10 + $0x38] sm:$0xff]  }
 0xaf5   : > { %1810 = vmatpush1.bf16.msra.mxu1 %v2855_v63  ;;  %v2911_v63 = vld [vmem:[#allocation10 + $0xf8] sm:$0xff]  }
 0xaf6   : > { %1811 = vmatprep.subr.bf16.mxu1 %v2863_v3  ;;  %1769 = vmatpush1.bf16.msra.mxu0 %v2858_v4  ;;  %v2913_v3 = vld [vmem:[#allocation10 + $0xb8] sm:$0xff]   ;;  %v1582_v4 = vsub.s32 0, %v3523_v39 }
 0xaf7   : > { %1770 = vmatprep.subr.bf16.mxu0 %v2866_v6  ;;  %v1578_v6 = vld [vmem:[%s3750_s5] sm:$0xf] }
 0xaf9   : > { %1812 = vmatpush1.bf16.msra.mxu1 %v2861_v5  ;;  %v1590_v5 = vsub.s32 2, %v3523_v39 }
 0xafa   : > { %1813 = vmatprep.subr.bf16.mxu1 %v2869_v7  ;;  %1771 = vmatpush1.bf16.msra.mxu0 %v2864_v8  ;;  %v1586_v7 = vsub.s32 1, %v3523_v39  ;;  %v1594_v8 = vsub.s32 3, %v3523_v39 }
 0xafb   : > { %1772 = vmatprep.subr.bf16.mxu0 %v2872_v10  ;;  %v1591_v10 = vrot.slane %v1578_v6, %v1590_v5 }
 0xafd   : > { %1814 = vmatpush1.bf16.msra.mxu1 %v2867_v9  ;;  %v1583_v9 = vrot.slane %v1578_v6, %v1582_v4 }
 0xafe   : > { %1815 = vmatprep.subr.bf16.mxu1 %v2875_v40  ;;  %1773 = vmatpush1.bf16.msra.mxu0 %v2870_v41  ;;  %v1587_v40 = vrot.slane %v1578_v6, %v1586_v7  ;;  %v1595_v41 = vrot.slane %v1578_v6, %v1594_v8 }
 0xb01   : > { %1816 = vmatpush1.bf16.msra.mxu1 %v2873_v11 }
 0xb02   : > { %1817 = vmatprep.subr.bf16.mxu1 %v2881_v13 }
 0xbbb   : > { %v1493_v33 = vpop.f32.mrb[24].mxu1 }
 0xbbc   : > { %v1500_v34 = vadd.f32 %v1493_v33, %v1313_v12  ;;  %v2689_v35 = vpop.f32.mrb[25].mxu1  ;;  %v2878_v12 = vld [vmem:[#allocation8 + $0xe4] ss:$16 sps:$4 sm:$0xff]  }
 0xbbd   : > { %v1496_v36 = vpop.f32.mrb[26].mxu1  ;;  %1774 = vmatprep.subr.bf16.mxu0 %v2878_v12 }
 0xbbe   : > { %v1501_v37 = vadd.f32 %v1496_v36, %v1314_v15  ;;  %v2690_v38 = vpop.f32.mrb[27].mxu1  ;;  %v1502_v27 = vadd.f32 %v1500_v34, %v3489_v17  ;;  %v2879_v15 = vld [vmem:[#allocation8 + $0xe8] ss:$16 sps:$4 sm:$0xff]   ;;  %1775 = vmatpush1.bf16.msra.mxu0 %v2876_v14  ;;  %v2884_v36 = vld [vmem:[#allocation10] sm:$0xff]  }
 0xbbf   : > { %1818 = vmatpush1.bf16.msra.mxu1 %v2879_v15  ;;  %2547 = vmatprep.subr.bf16.mxu0 %v2882_v16 }
 0xbc0   : > { %1506 = vadd.xlane.f32.xlu1 %v1502_v27  ;;  %v1503_v42 = vadd.f32 %v1501_v37, %v3492_v18  ;;  %2569 = vmatprep.subr.bf16.mxu1 %v2883_v19  ;;  %v2885_v37 = vld [vmem:[#allocation10 + $0x80] sm:$0xff]  }
 0xbc4   : > { %1508 = vadd.xlane.f32.xlu1 %v1503_v42 }
 0xc4d   : > { %v1507_v17 = vpop.xlane.xlu1 %1506 }
 0xc4e   : > { %v1511_v50 = vmul.f32 0.0078125, %v1507_v17  ;;  %v2896_v17 = vld [vmem:[#allocation10 + $0x18] sm:$0xff]  }
 0xc50   : > { %v3653_v18 = vsub.f32 %v1502_v27, %v1511_v50  ;;  %v2886_v27 = vld [vmem:[#allocation10 + $0x48] sm:$0xff]   ;;  %v2897_v50 = vld [vmem:[#allocation10 + $0x98] sm:$0xff]  }
 0xc51   : > { %v1509_v51 = vpop.xlane.xlu1 %1508 }
 0xc52   : > { %v1512_v52 = vmul.f32 0.0078125, %v1509_v51  ;;  %v1515_v53 = vmul.f32 %v3653_v18, %v3653_v18  ;;  %v2899_v51 = vld [vmem:[#allocation10 + $0xe0] sm:$0xff]  }
 0xc54   : > { %v3657_v54 = vsub.f32 %v1503_v42, %v1512_v52  ;;  %1517 = vadd.xlane.f32.xlu1 %v1515_v53  ;;  %v2887_v42 = vld [vmem:[#allocation10 + $0xc8] sm:$0xff]   ;;  %v2900_v52 = vld [vmem:[#allocation10 + $0x20] sm:$0xff]  }
 0xc55   : > { %v2901_v53 = vld [vmem:[#allocation10 + $0xa0] sm:$0xff]  }
 0xc56   : > { %v1516_v55 = vmul.f32 %v3657_v54, %v3657_v54 }
 0xc58   : > { %1519 = vadd.xlane.f32.xlu1 %v1516_v55  ;;  %v2903_v55 = vld [vmem:[#allocation10 + $0xe8] sm:$0xff]  }
 0xce1   : > { %v1518_v21 = vpop.xlane.xlu1 %1517 }
 0xce2   : > { %v1521_v22 = vmul.f32 0.0078125, %v1518_v21 }
 0xce4   : > { %v1523_v23 = vadd.f32 1e-05, %v1521_v22 }
 0xce5   : > { %v1520_v24 = vpop.xlane.xlu1 %1519 }
 0xce6   : > { %2946 = vrsqrt.f32 %v1523_v23  ;;  %v1522_v25 = vmul.f32 0.0078125, %v1520_v24 }
 0xce8   : > { %v1524_v1 = vadd.f32 1e-05, %v1522_v25 }
 0xcea   : > { %2948 = vrsqrt.f32 %v1524_v1 }
 0xcf0   : > { %v2947_v26 = vpop.eup %2946 }
 0xcf1   : > { %v1527_v20 = vmul.f32 %v2947_v26, %v3653_v18  ;;  %v2898_v18 = vld [vmem:[#allocation10 + $0x60] sm:$0xff]  }
 0xcf3   : > { %v1535_v31 = vmul.f32 %v2434_v28, %v1527_v20 }
 0xcf4   : > { %v2949_v29 = vpop.eup %2948 }
 0xcf5   : > { %v1528_v30 = vmul.f32 %v2949_v29, %v3657_v54  ;;  %v3669_v34 = vadd.f32 %v2435_v32, %v1535_v31  ;;  %v2902_v54 = vld [vmem:[#allocation10 + $0x68] sm:$0xff]  }
 0xcf7   : > { %v1536_v33 = vmul.f32 %v2434_v28, %v1528_v30 }
 0xcf9   : > { %v3671_v35 = vadd.f32 %v2435_v32, %v1536_v33 }
 0xcfb   : > { %v1545_v38 = vpack.c.bf16 %v3671_v35, %v3669_v34 }
 0xcfd   : > { %1793 = vmatmul.mubr.bf16.vlgmr.msra.gmra.mrb[28].mxu0 %v1545_v38  ;;  %1836 = vmatmul.mubr.bf16.vlgmr.msra.gmra.mrb[28].mxu1 %v1545_v38 }
 0xcfe   : > { %2548 = vmatpush3.bf16.msra.mxu0 %v2884_v36  ;;  %2570 = vmatpush3.bf16.msra.mxu1 %v2885_v37 }
 0xcff   : > { %2549 = vmatprep.subr.bf16.mxu0 %v2886_v27  ;;  %2571 = vmatprep.subr.bf16.mxu1 %v2887_v42 }
 0xd02   : > { %2550 = vmatpush3.bf16.msra.mxu0 %v2888_v43  ;;  %2572 = vmatpush3.bf16.msra.mxu1 %v2889_v44 }
 0xd03   : > { %2551 = vmatprep.subr.bf16.mxu0 %v2890_v45  ;;  %2573 = vmatprep.subr.bf16.mxu1 %v2891_v47  ;;  %v2468_v47 = vld [vmem:[%s3752_s7] ss:$0 sm:$0xff] }
 0xd06   : > { %2552 = vmatpush3.bf16.msra.mxu0 %v2892_v49  ;;  %2574 = vmatpush3.bf16.msra.mxu1 %v2893_v46 }
 0xd07   : > { %2553 = vmatprep.subr.bf16.mxu0 %v2894_v0  ;;  %2575 = vmatprep.subr.bf16.mxu1 %v2895_v48 }
 0xd0a   : > { %2554 = vmatpush3.bf16.msra.mxu0 %v2896_v17  ;;  %2576 = vmatpush3.bf16.msra.mxu1 %v2897_v50 }
 0xd0b   : > { %2555 = vmatprep.subr.bf16.mxu0 %v2898_v18  ;;  %2577 = vmatprep.subr.bf16.mxu1 %v2899_v51 }
 0xd0e   : > { %2556 = vmatpush3.bf16.msra.mxu0 %v2900_v52  ;;  %2578 = vmatpush3.bf16.msra.mxu1 %v2901_v53 }
 0xd0f   : > { %2557 = vmatprep.subr.bf16.mxu0 %v2902_v54  ;;  %2579 = vmatprep.subr.bf16.mxu1 %v2903_v55 }
 0xd12   : > { %2558 = vmatpush3.bf16.msra.mxu0 %v2904_v56  ;;  %2580 = vmatpush3.bf16.msra.mxu1 %v2905_v57 }
 0xd13   : > { %2559 = vmatprep.subr.bf16.mxu0 %v2906_v58  ;;  %2581 = vmatprep.subr.bf16.mxu1 %v2907_v59 }
 0xd16   : > { %2560 = vmatpush3.bf16.msra.mxu0 %v2908_v60  ;;  %2582 = vmatpush3.bf16.msra.mxu1 %v2909_v61 }
 0xd17   : > { %2561 = vmatprep.subr.bf16.mxu0 %v2910_v62  ;;  %2583 = vmatprep.subr.bf16.mxu1 %v2911_v63 }
 0xd1a   : > { %2562 = vmatpush3.bf16.msra.mxu0 %v2912_v2  ;;  %2584 = vmatpush3.bf16.msra.mxu1 %v2913_v3 }
 0xdd0   : > { %v1794_v11 = vpop.f32.mrb[28].mxu0  ;;  %v1837_v12 = vpop.f32.mrb[28].mxu1 }
 0xdd1   : > { %v1795_v13 = vadd.f32 %v1794_v11, %v1583_v9  ;;  %v1838_v14 = vadd.f32 %v1837_v12, %v1591_v10  ;;  %v1796_v15 = vpop.f32.mrb[29].mxu0  ;;  %v1839_v16 = vpop.f32.mrb[29].mxu1  ;;  %v2502_v11 = vld [vmem:[%s3786_s1] ss:$0 sm:$0xff] }
 0xdd2   : > { %v1797_v19 = vadd.f32 %v1796_v15, %v1587_v40  ;;  %v1840_v21 = vadd.f32 %v1839_v16, %v1595_v41  ;;  %v1798_v22 = vpop.f32.mrb[30].mxu0  ;;  %v1841_v23 = vpop.f32.mrb[30].mxu1 }
 0xdd3   : > { %v1799_v24 = vadd.f32 %v1798_v22, %v1583_v9  ;;  %v1842_v25 = vadd.f32 %v1841_v23, %v1591_v10  ;;  %v1800_v1 = vpop.f32.mrb[31].mxu0  ;;  %v1843_v26 = vpop.f32.mrb[31].mxu1  ;;  %v1846_v28 = vmax.f32 %v1795_v13, 0.0  ;;  %v1848_v29 = vmax.f32 %v1838_v14, 0.0 }
 0xdd4   : > { %v1801_v20 = vadd.f32 %v1800_v1, %v1587_v40  ;;  %v1844_v39 = vadd.f32 %v1843_v26, %v1595_v41  ;;  %v1847_v32 = vmax.f32 %v1797_v19, 0.0  ;;  %v1849_v33 = vmax.f32 %v1840_v21, 0.0  ;;  %v2501_v40 = vld [vmem:[%s3785_s17] ss:$0 sm:$0xff]  ;;  %s3102_s17 = scalar_lea.vmem %s3101_s11, 512 }
 0xdd5   : > { %v1850_v30 = vmax.f32 %v1799_v24, 0.0  ;;  %v1852_v31 = vmax.f32 %v1842_v25, 0.0  ;;  %p3104_p2 = scmp.lt.s32.totalorder %s3102_s17, %s3096_s29 }
 0xdd6   : > { %v1851_v36 = vmax.f32 %v1801_v20, 0.0  ;;  %v1853_v37 = vmax.f32 %v1844_v39, 0.0 }
 0xdd7   : > { %v1854_v38 = vpack.c.bf16 %v1850_v30, %v1846_v28  ;;  %v1856_v27 = vpack.c.bf16 %v1852_v31, %v1848_v29  ;;  %p3105_p1 = por %p3104_p2, %p3103_p12 }
 0xdd8   : > { %v1855_v42 = vpack.c.bf16 %v1851_v36, %v1847_v32  ;;  %v1857_v43 = vpack.c.bf16 %v1853_v37, %v1849_v33 }
 0xdd9   : > { %p3106_p13 = pnand %p3105_p1, %p3099_p7 }
 0xdda   : > { %2153 = vmatprep.mubr.bf16.mxu0 %v1855_v42  ;;  %2194 = vmatprep.mubr.bf16.mxu1 %v1857_v43 }
 0xddb   : > { %2154 = vmatmul.mubr.bf16.vlgmr.msra.gmra.mrb[32].mxu0 %v1854_v38  ;;  %2195 = vmatmul.mubr.bf16.vlgmr.msra.gmra.mrb[32].mxu1 %v1856_v27 }
 0xeae   : > { %v2563_v44 = vpop.f32.mrb[32].mxu0  ;;  %v2585_v45 = vpop.f32.mrb[32].mxu1 }
 0xeaf   : > { %v2564_v49 = vpop.f32.mrb[33].mxu0  ;;  %v2586_v46 = vpop.f32.mrb[33].mxu1 }
 0xeb0   : > { %v2565_v0 = vadd.f32 %v2564_v49, %v2563_v44  ;;  %v2587_v48 = vadd.f32 %v2586_v46, %v2585_v45  ;;  %v2566_v17 = vpop.f32.mrb[34].mxu0  ;;  %v2588_v50 = vpop.f32.mrb[34].mxu1 }
 0xeb1   : > { %v2567_v18 = vpop.f32.mrb[35].mxu0  ;;  %v2589_v51 = vpop.f32.mrb[35].mxu1 }
 0xeb2   : > { %v2156_v52 = vadd.f32 %v2565_v0, %v2468_v47  ;;  %v2568_v53 = vadd.f32 %v2567_v18, %v2566_v17  ;;  %v2590_v54 = vadd.f32 %v2589_v51, %v2588_v50 }
 0xeb4   : > { %v2197_v55 = vadd.f32 %v2587_v48, %v2156_v52  ;;  %v2159_v56 = vadd.f32 %v2568_v53, %v2468_v47 }
 0xeb6   : > { %v2200_v57 = vadd.f32 %v2590_v54, %v2159_v56  ;;  %v2203_v58 = vadd.f32 %v2197_v55, %v3669_v34 }
 0xeb8   : > { %2207 = vadd.xlane.f32.xlu1 %v2203_v58  ;;  %v2204_v59 = vadd.f32 %v2200_v57, %v3671_v35 }
 0xebc   : > { %2209 = vadd.xlane.f32.xlu1 %v2204_v59 }
 0xf45   : > { %v2208_v60 = vpop.xlane.xlu1 %2207 }
 0xf46   : > { %v2211_v61 = vmul.f32 0.0078125, %v2208_v60 }
 0xf48   : > { %v2213_v62 = vsub.f32 %v2203_v58, %v2211_v61 }
 0xf49   : > { %v2210_v63 = vpop.xlane.xlu1 %2209 }
 0xf4a   : > { %v2212_v2 = vmul.f32 0.0078125, %v2210_v63  ;;  %v2215_v3 = vmul.f32 %v2213_v62, %v2213_v62 }
 0xf4c   : > { %v2214_v4 = vsub.f32 %v2204_v59, %v2212_v2  ;;  %2217 = vadd.xlane.f32.xlu0 %v2215_v3 }
 0xf4e   : > { %v2216_v5 = vmul.f32 %v2214_v4, %v2214_v4 }
 0xf50   : > { %2219 = vadd.xlane.f32.xlu1 %v2216_v5 }
 0xfd9   : > { %v2218_v6 = vpop.xlane.xlu0 %2217 }
 0xfda   : > { %v2221_v7 = vmul.f32 0.0078125, %v2218_v6 }
 0xfdc   : > { %v2223_v8 = vadd.f32 1e-05, %v2221_v7 }
 0xfdd   : > { %v2220_v34 = vpop.xlane.xlu1 %2219 }
 0xfde   : > { %2950 = vrsqrt.f32 %v2223_v8  ;;  %v2222_v9 = vmul.f32 0.0078125, %v2220_v34 }
 0xfe0   : > { %v2224_v35 = vadd.f32 1e-05, %v2222_v9 }
 0xfe2   : > { %2952 = vrsqrt.f32 %v2224_v35 }
 0xfe8   : > { %v2951_v10 = vpop.eup %2950 }
 0xfe9   : > { %v2227_v41 = vmul.f32 %v2951_v10, %v2213_v62 }
 0xfeb   : > { %v2235_v12 = vmul.f32 %v2501_v40, %v2227_v41 }
 0xfec   : > { %v2953_v13 = vpop.eup %2952 }
 0xfed   : > { %v2243_v14 = vadd.f32 %v2502_v11, %v2235_v12  ;;  %v2228_v15 = vmul.f32 %v2953_v13, %v2214_v4 }
 0xfef   : > { %v2236_v16 = vmul.f32 %v2501_v40, %v2228_v15  ;;  %2245 = vst [vmem:[%s489_s13] sm:$0xff] %v2243_v14 }
 0xff1   : > { %v2244_v19 = vadd.f32 %v2502_v11, %v2236_v16 }
 0xff3   : > { %2246 = vst [vmem:[%s489_s13 + $0x8] sm:$0xff] %v2244_v19 }
 0xff4   : > { %3109 = shalt.err (!%p3106_p13)
}
 0xff5   : > { %s3110_s16 = scalar_lea.hbm %s3699_s26, 256  ;;  %s3114_s18 = scalar_lea.hbm %s3787_s10, 512 }
 0xff6   : > { %p3111_p9 = scmp.ne.s32.totalorder %s3699_s26, %s3110_s16  ;;  %p3115_p4 = scmp.lt.u32.totalorder %s3699_s26, %s3787_s10 }
 0xff7   : > { %p3116_p8 = scmp.lt.u32.totalorder %s3114_s18, %s3110_s16  ;;  %p3118_p3 = scmp.lt.u32.totalorder %s3110_s16, %s3699_s26 }
 0xff8   : > { %p3112_p0 = pnand %p3111_p9, %p3415_p10 }
 0xff9   : > { %p3117_p6 = por %p3116_p8, %p3115_p4 }
 0xffa   : > { %p3113_p11 = pneg %p3112_p0 }
 0xffb   : > { %p3119_p5 = por %p3118_p3, %p3117_p6 }
 0xffd   : > { %p3120_p7 = pnand %p3119_p5, %p3113_p11 }
 0xfff   : > { %3123 = shalt.err (!%p3120_p7)
}
0x1000   : > { %s3192_s14 = smov 128   ;;  %s3193_s29 = smov 8  }
0x1001   : > { %2709 = dma.vmem_to_hbm [thread:$0]  (%p3415_p10), %s3701_s21, 256, %s3699_s26, %s2248_s27, %s3192_s14, %s3192_s14, %s3193_s29  }
0x1002 PF: > { %s3788_s25 = sld [smem:[#allocation16_spill]]  ;;  %s3789_s11 = sld [smem:[#allocation17_spill]] }
0x1003   : > { %p3791_p2 = scmp.ge.s32.totalorder %s3170_s24, 2 }
0x1008   : > { %s2276_s17 = sand.u32 1, %s3788_s25   ;;  %p3790_p12 = scmp.ne.s32.totalorder %s3789_s11, 0 }
0x1009   : > { %s2277_s16 = scalar_lea.sflag [#allocation4], %s2276_s17 }
0x100a   : > { %p2729_p1 = pnand %p3791_p2, %p3790_p12 }
0x100c   : > { %3153 = dma.done.wait (!%p2729_p1), %s2277_s16, 256  }
0x100d   : > { %3155 = vsyncadd (!%p2729_p1), %s2277_s16, 4294967040  ;;  %p27_p13 = scmp.ge.s32.totalorder %s3405_s30, 4   ;;  %s3792_s21 = smov %s3162_s22 }
0x100e   : > { %s3793_s22 = smov %s3166_s23  ;;  %s3794_s23 = smov %s3421_s20 }
0x100f   : > { %s3795_s24 = smov %s3405_s30  ;;  %29 = sbr.rel (!%p27_p13) target bundleno = 12 (0xc), region = 132 }
0x1016   :  { %2282 = vsyncpa [#allocation3], 1 }
0x1017   :  { %2284 = vsyncpa [#allocation3 + $0x1], 1 }
0x1018   :  { %2285 = vsyncpa [#allocation6], 1 }
0x1019   :  { %2286 = vsyncpa [#allocation9], 1 }
0x101a   :  { %2287 = vsyncpa [#allocation4], 1 }
0x101b   :  { %2289 = vsyncpa [#allocation4 + $0x1], 1 }

</bundles_post_ra>
